<compile_context>
chip_gen: v7x
topology: tpu7x:2x2x1
jax: 0.10.0
libtpu: 0.0.40
codegen_flags: <defaults>
</compile_context>

<pallas_src>
import functools
import math

import jax
import jax.numpy as jnp
from jax.experimental import pallas as pl
from jax.experimental.pallas import tpu as pltpu


_LN_EPS = 1e-12


def _layernorm(x, gamma, beta, eps=_LN_EPS):
    mean = jnp.mean(x, axis=-1, keepdims=True)
    var = jnp.mean((x - mean) ** 2, axis=-1, keepdims=True)
    return (x - mean) * jax.lax.rsqrt(var + eps) * gamma + beta


# ------------------------------- kernel body -------------------------------
def _cross_attn_ffn_kernel(
    n_head, mxu_dtype, exp_dtype, approx_recip,
    q_ref, k_ref, v_ref,
    wq_ref, bq_ref, wk_ref, bk_ref, wv_ref, bv_ref,
    wch_ref, bc_ref,
    gamma_ref, beta_ref,
    w1_ref, b1_ref, w2_ref, b2_ref,
    out_ref,
):
    TB, S, q_dim = q_ref.shape
    _, Sk, _ = k_ref.shape
    H = n_head
    dh = wch_ref.shape[1]
    d_model = H * dh

    def mm(act, w_ref, b_ref):
        # MXU matmul: operands in mxu_dtype (bf16 on the fast path), f32 accum.
        return jnp.dot(act.astype(mxu_dtype), w_ref[...].astype(mxu_dtype),
                       preferred_element_type=jnp.float32) + b_ref[...]

    # ---- fold (batch, seq) into the matmul row dim: M = TB*S / TB*Sk rows ----
    q_raw = q_ref[...]
    q_res = q_raw.astype(jnp.float32).reshape(TB * S, q_dim)     # residual (f32)
    q_mxu = q_raw.astype(mxu_dtype).reshape(TB * S, q_dim)
    k_mxu = k_ref[...].astype(mxu_dtype).reshape(TB * Sk, -1)
    v_mxu = v_ref[...].astype(mxu_dtype).reshape(TB * Sk, -1)

    # Projections. 1/sqrt(dh) is already folded into wq/bq (host-side).
    # Cast the projected activations to the MXU dtype ONCE (halves the bytes
    # the per-head slices below have to move).
    qp = mm(q_mxu, wq_ref, bq_ref).reshape(TB, S, d_model).astype(mxu_dtype)
    kp = mm(k_mxu, wk_ref, bk_ref).reshape(TB, Sk, d_model).astype(mxu_dtype)
    vp = mm(v_mxu, wv_ref, bv_ref).reshape(TB, Sk, d_model).astype(mxu_dtype)

    # ---- per-head attention, batched over the TB tile; no concat:
    #      attn_out = sum_h ctx_h @ w_concat[h]  (== concat(ctx) @ w_concat) ----
    attn_acc = None
    for h in range(H):
        lo = h * dh
        qh = qp[:, :, lo:lo + dh]                                 # (TB, S , dh)
        kh = kp[:, :, lo:lo + dh]                                 # (TB, Sk, dh)
        vh = vp[:, :, lo:lo + dh]                                 # (TB, Sk, dh)
        s = jax.lax.dot_general(                                  # 'bqd,bkd->bqk'
            qh, kh, dimension_numbers=(((2,), (2,)), ((0,), (0,))),
            preferred_element_type=jnp.float32)                   # (TB, S, Sk)
        s = s - jnp.max(s, axis=-1, keepdims=True)
        p = jnp.exp(s.astype(exp_dtype)).astype(jnp.float32)
        p = p * pl.reciprocal(jnp.sum(p, axis=-1, keepdims=True),
                              approx=approx_recip)
        ctx = jax.lax.dot_general(                                # 'bqk,bkd->bqd'
            p.astype(mxu_dtype), vh,
            dimension_numbers=(((2,), (1,)), ((0,), (0,))),
            preferred_element_type=jnp.float32)                   # (TB, S, dh)
        part = jnp.dot(ctx.reshape(TB * S, dh).astype(mxu_dtype),
                       wch_ref[h].astype(mxu_dtype),
                       preferred_element_type=jnp.float32)        # (TB*S, q_dim)
        attn_acc = part if attn_acc is None else attn_acc + part

    attn_out = attn_acc + bc_ref[...]

    # ---- residual + norm #1, FFN, residual + norm #2 (same norm params) ----
    gamma = gamma_ref[...]
    beta = beta_ref[...]
    x = _layernorm(attn_out + q_res, gamma, beta)
    h1 = jnp.maximum(mm(x, w1_ref, b1_ref), 0.0)
    y = mm(h1, w2_ref, b2_ref)
    out = _layernorm(y + x, gamma, beta)

    out_ref[...] = out.reshape(TB, S, q_dim).astype(out_ref.dtype)


# --------------------------- host-side utilities ---------------------------
def _vmem_capacity_bytes():
    """Physical VMEM per core; conservative 64 MiB (v7x) fallback."""
    try:
        info = pltpu.get_tpu_info()
        for name in ("vmem_capacity_bytes", "vmem_bytes", "vmem_size_bytes"):
            val = getattr(info, name, None)
            if val:
                return int(val)
    except Exception:
        pass
    return 64 << 20


@functools.lru_cache(maxsize=None)
def _buffered_weight_mode_supported():
    """Feature-detect BlockSpec(pipeline_mode=pl.Buffered(1)) once (tiny probe)."""
    if not hasattr(pl, "Buffered"):
        return False
    try:
        def probe(w_ref, x_ref, o_ref):
            o_ref[...] = x_ref[...] + w_ref[...]

        out = pl.pallas_call(
            probe,
            out_shape=jax.ShapeDtypeStruct((16, 128), jnp.float32),
            grid=(2,),
            in_specs=[pl.BlockSpec((8, 128), lambda i: (0, 0),
                                   pipeline_mode=pl.Buffered(1)),
                      pl.BlockSpec((8, 128), lambda i: (i, 0))],
            out_specs=pl.BlockSpec((8, 128), lambda i: (i, 0)),
        )(jnp.ones((8, 128), jnp.float32), jnp.ones((16, 128), jnp.float32))
        jax.block_until_ready(out)
        return True
    except Exception:
        return False


def _const_index_map(ndim):
    zeros = (0,) * ndim
    return lambda b: zeros


def _pick_batch_tile(bs, S, Sk, q_dim, k_dim, d_model, hidden, n_head,
                     io_itemsize, mxu_itemsize, weight_vmem_bytes,
                     vmem_budget, target_rows):
    """Largest VMEM-fitting batch tile that keeps >= 2 grid steps and
    ~target_rows folded matmul rows."""
    dh = d_model // n_head

    def est_bytes(tb):
        rq, rk = tb * S, tb * Sk
        act = 2 * (rq * q_dim + 2 * rk * k_dim + rq * q_dim) * io_itemsize
        proj = (rq + 2 * rk) * d_model * (4 + mxu_itemsize)
        attn = rq * Sk * 4 * 2 + rq * dh * 4 + rq * q_dim * 4
        ffn = rq * (2 * q_dim + hidden) * 4
        return act + proj + attn + ffn + weight_vmem_bytes

    max_tb = bs if bs < 2 else bs // 2          # >= 2 grid steps (v7x megacore + pipelining)
    cands = [t for t in range(1, max_tb + 1)
             if bs % t == 0 and est_bytes(t) <= vmem_budget]
    if not cands:
        return 1
    reaching = [t for t in cands if t * S >= target_rows]
    return min(reaching) if reaching else max(cands)


def prepare_params(params, *, n_head, mxu_dtype=jnp.bfloat16):
    """One-time host transform of the module parameters for the fused kernel.

    params = (wq, bq, wk, bk, wv, bv, wc, bc, gamma, beta, w1, b1, w2, b2),
    Linear weights as (in_features, out_features).
    """
    (wq, bq, wk, bk, wv, bv, wc, bc, gamma, beta, w1, b1, w2, b2) = params
    q_dim, d_model = wq.shape
    if d_model % n_head != 0:
        raise ValueError(f"d_model={d_model} must be divisible by n_head={n_head}")
    dh = d_model // n_head
    if wc.shape != (d_model, q_dim):
        raise ValueError("w_concat must map d_model -> q_dim (residual add)")
    if w1.shape[0] != q_dim or w2.shape[1] != q_dim:
        raise ValueError("FFN dims incompatible with residual (need q_dim == d_model)")

    # Fold the 1/sqrt(dh) attention scale into the q projection.
    inv_scale = jnp.float32(1.0 / math.sqrt(dh))
    wq = wq * inv_scale
    bq = bq * inv_scale
    # Per-head w_concat: kernel accumulates attn_out = sum_h ctx_h @ wc[h].
    wc_h = wc.reshape(n_head, dh, q_dim)

    weights = (wq, wk, wv, wc_h, w1, w2)
    if mxu_dtype != jnp.float32:
        weights = tuple(w.astype(mxu_dtype) for w in weights)
    wq, wk, wv, wc_h, w1, w2 = weights

    f32 = lambda a: a.astype(jnp.float32)
    return (wq, f32(bq), wk, f32(bk), wv, f32(bv), wc_h, f32(bc),
            f32(gamma), f32(beta), w1, f32(b1), w2, f32(b2))


def _build_call(bs, S, Sk, q_dim, k_dim, io_dtype, prepared, n_head,
                mxu_dtype, exp_dtype, approx_recip, batch_tile,
                vmem_limit_bytes):
    use_buffered = _buffered_weight_mode_supported()

    def wspec(arr):
        if use_buffered:
            return pl.BlockSpec(arr.shape, _const_index_map(arr.ndim),
                                pipeline_mode=pl.Buffered(1))
        return pl.BlockSpec(arr.shape, _const_index_map(arr.ndim))

    in_specs = [
        pl.BlockSpec((batch_tile, S, q_dim), lambda b: (b, 0, 0)),
        pl.BlockSpec((batch_tile, Sk, k_dim), lambda b: (b, 0, 0)),
        pl.BlockSpec((batch_tile, Sk, k_dim), lambda b: (b, 0, 0)),
    ] + [wspec(p) for p in prepared]
    out_spec = pl.BlockSpec((batch_tile, S, q_dim), lambda b: (b, 0, 0))

    kernel = functools.partial(_cross_attn_ffn_kernel, n_head, mxu_dtype,
                               exp_dtype, approx_recip)

    d_model = prepared[0].shape[1]
    hidden = prepared[10].shape[1]
    flops = 2 * bs * (
        S * q_dim * d_model            # q projection
        + 2 * Sk * k_dim * d_model     # k, v projections
        + 2 * S * Sk * d_model         # scores + p@v over all heads
        + S * d_model * q_dim          # w_concat (accumulated per head)
        + S * q_dim * hidden           # ffn linear1
        + S * hidden * q_dim           # ffn linear2
    )
    transcendentals = bs * (n_head * S * (Sk + 1)   # softmax exp + reciprocal
                            + 2 * S)                # two LayerNorm rsqrt per row
    io_itemsize = jnp.dtype(io_dtype).itemsize
    bytes_accessed = ((2 * bs * S * q_dim + 2 * bs * Sk * k_dim) * io_itemsize
                      + sum(int(p.size) * p.dtype.itemsize for p in prepared))

    return pl.pallas_call(
        kernel,
        out_shape=jax.ShapeDtypeStruct((bs, S, q_dim), io_dtype),
        grid_spec=pltpu.PrefetchScalarGridSpec(
            num_scalar_prefetch=0,
            grid=(bs // batch_tile,),
            in_specs=in_specs,
            out_specs=out_spec,
        ),
        compiler_params=pltpu.CompilerParams(
            dimension_semantics=("parallel",),
            vmem_limit_bytes=int(vmem_limit_bytes)),
        cost_estimate=pl.CostEstimate(
            flops=int(flops),
            transcendentals=int(transcendentals),
            bytes_accessed=int(bytes_accessed)),
    )


def cross_attention_ffn_layer(q, k, v, prepared_params, *, n_head,
                              mxu_dtype=jnp.bfloat16, io_dtype=None,
                              exp_dtype=jnp.float32, batch_tile=None):
    """q: (bs, S, q_dim); k, v: (bs, Sk, k_dim) -> (bs, S, q_dim)."""
    bs, S, q_dim = q.shape
    _, Sk, k_dim = k.shape
    if k.shape[0] != bs or v.shape != k.shape:
        raise ValueError("q/k/v batch sizes or k/v shapes inconsistent")

    # bf16 activations at the pallas_call boundary on the fast path (halves
    # activation DMA and double-buffered input VMEM); f32 on the exact path.
    if io_dtype is None:
        io_dtype = jnp.bfloat16 if mxu_dtype != jnp.float32 else jnp.float32
    q = q.astype(io_dtype)
    k = k.astype(io_dtype)
    v = v.astype(io_dtype)

    prepared = tuple(prepared_params)
    d_model = prepared[0].shape[1]
    hidden = prepared[10].shape[1]
    if prepared[0].shape[0] != q_dim or prepared[2].shape[0] != k_dim:
        raise ValueError("prepared params do not match q/k feature dims")

    capacity = _vmem_capacity_bytes()
    vmem_budget = int(capacity * 0.6)
    target_rows = 1024 if vmem_budget > (48 << 20) else 512
    weight_mult = 1 if _buffered_weight_mode_supported() else 2
    weight_vmem = weight_mult * sum(int(p.size) * p.dtype.itemsize
                                    for p in prepared)
    if batch_tile is None:
        batch_tile = _pick_batch_tile(
            bs, S, Sk, q_dim, k_dim, d_model, hidden, n_head,
            io_itemsize=jnp.dtype(io_dtype).itemsize,
            mxu_itemsize=jnp.dtype(mxu_dtype).itemsize,
            weight_vmem_bytes=weight_vmem,
            vmem_budget=vmem_budget,
            target_rows=target_rows)
    if bs % batch_tile != 0:
        raise ValueError("batch_tile must divide the batch size")

    fn = _build_call(bs, S, Sk, q_dim, k_dim, io_dtype, prepared, n_head,
                     mxu_dtype, exp_dtype, mxu_dtype != jnp.float32,
                     batch_tile,
                     vmem_limit_bytes=min(int(capacity * 0.85), 120 << 20))
    return fn(q, k, v, *prepared)


# ----------------------------- pure-JAX reference -----------------------------
def _reference(q, k, v, params, *, n_head):
    (wq, bq, wk, bk, wv, bv, wc, bc, gamma, beta, w1, b1, w2, b2) = params
    d_model = wq.shape[1]
    dh = d_model // n_head

    qp = q @ wq + bq
    kp = k @ wk + bk
    vp = v @ wv + bv

    def split(x):  # (bs, S, d_model) -> (bs, n_head, S, dh)
        bs, S, _ = x.shape
        return x.reshape(bs, S, n_head, dh).transpose(0, 2, 1, 3)

    qs, ks, vs = split(qp), split(kp), split(vp)
    sc = jnp.einsum("bhqd,bhkd->bhqk", qs, ks) / math.sqrt(dh)
    p = jax.nn.softmax(sc, axis=-1)
    ctx = jnp.einsum("bhqk,bhkd->bhqd", p, vs)
    bs, _, S, _ = ctx.shape
    ctx = ctx.transpose(0, 2, 1, 3).reshape(bs, S, d_model)
    attn_out = ctx @ wc + bc

    x = _layernorm(attn_out + q, gamma, beta)
    y = jnp.maximum(x @ w1 + b1, 0.0) @ w2 + b2
    return _layernorm(y + x, gamma, beta)


# ----------------------------------- main -----------------------------------
if __name__ == "__main__":
    bs, S, Sk = 2, 8, 8
    q_dim = 32          # == d_model so residual / FFN dims are consistent
    k_dim = 16
    d_model = 32
    n_head = 4
    hidden = d_model // 2

    key = jax.random.PRNGKey(0)
    keys = jax.random.split(key, 20)

    q = jax.random.normal(keys[0], (bs, S, q_dim), jnp.float32)
    k = jax.random.normal(keys[1], (bs, Sk, k_dim), jnp.float32)
    v = jax.random.normal(keys[2], (bs, Sk, k_dim), jnp.float32)

    def w(i, shape, scale=0.1):
        return scale * jax.random.normal(keys[i], shape, jnp.float32)

    raw_params = (
        w(3, (q_dim, d_model)),   w(4, (1, d_model)),    # w_q, b_q
        w(5, (k_dim, d_model)),   w(6, (1, d_model)),    # w_k, b_k
        w(7, (k_dim, d_model)),   w(8, (1, d_model)),    # w_v, b_v
        w(9, (d_model, q_dim)),   w(10, (1, q_dim)),     # w_concat, b_concat
        jnp.ones((1, q_dim), jnp.float32),               # layernorm gamma
        jnp.zeros((1, q_dim), jnp.float32),              # layernorm beta
        w(11, (q_dim, hidden)),   w(12, (1, hidden)),    # ffn linear1
        w(13, (hidden, d_model)), w(14, (1, d_model)),   # ffn linear2
    )

    ref = _reference(q, k, v, raw_params, n_head=n_head)

    # 1) exact-math path (f32 I/O + f32 MXU operands): tight semantic check.
    prep_f32 = prepare_params(raw_params, n_head=n_head, mxu_dtype=jnp.float32)
    out_f32 = cross_attention_ffn_layer(q, k, v, prep_f32, n_head=n_head,
                                        mxu_dtype=jnp.float32)
    out_f32 = jax.block_until_ready(out_f32)
    assert out_f32.shape == (bs, S, q_dim)
    assert jnp.allclose(out_f32, ref, rtol=1e-4, atol=1e-3), "f32 kernel mismatch"

    # 2) optimized path (bf16 I/O + bf16 MXU operands, f32 accumulation):
    #    looser check (approx softmax reciprocal => rows don't sum to exactly 1).
    prep_bf16 = prepare_params(raw_params, n_head=n_head, mxu_dtype=jnp.bfloat16)
    out_bf16 = cross_attention_ffn_layer(q, k, v, prep_bf16, n_head=n_head,
                                         mxu_dtype=jnp.bfloat16)
    out_bf16 = jax.block_until_ready(out_bf16)
    assert out_bf16.shape == (bs, S, q_dim)
    assert jnp.allclose(out_bf16.astype(jnp.float32), ref,
                        rtol=5e-2, atol=5e-2), "bf16 kernel mismatch"

    print("KERNEL_OK")
</pallas_src>

<mosaic_0001>
module attributes {stable_mosaic.version = 11 : i64} {
  func.func @probe(%arg0: i32, %arg1: memref<8x128xf32, #tpu.memory_space<vmem>>, %arg2: memref<8x128xf32, #tpu.memory_space<vmem>>, %arg3: memref<8x128xf32, #tpu.memory_space<vmem>>) attributes {dimension_semantics = [#tpu.dimension_semantics<arbitrary>], iteration_bounds = array<i64: 2>, scalar_prefetch = 0 : i64, scratch_operands = 0 : i64, tpu.core_type = #tpu.core_type<tc>, window_params = [{pipeline_mode = #tpu.pipeline_mode<synchronous>, transform_indices = @transform_0, window_bounds = array<i64: 8, 128>}, {transform_indices = @transform_1, window_bounds = array<i64: 8, 128>}, {transform_indices = @transform_2, window_bounds = array<i64: 8, 128>}]} {
    %c0 = arith.constant 0 : index
    %c0_0 = arith.constant 0 : index
    %0 = vector.load %arg2[%c0, %c0_0] : memref<8x128xf32, #tpu.memory_space<vmem>>, vector<8x128xf32>
    %c0_1 = arith.constant 0 : index
    %c0_2 = arith.constant 0 : index
    %1 = vector.load %arg1[%c0_1, %c0_2] : memref<8x128xf32, #tpu.memory_space<vmem>>, vector<8x128xf32>
    %2 = arith.addf %0, %1 : vector<8x128xf32>
    %c0_3 = arith.constant 0 : index
    %c0_4 = arith.constant 0 : index
    %3 = vector.load %arg3[%c0_3, %c0_4] : memref<8x128xf32, #tpu.memory_space<vmem>>, vector<8x128xf32>
    tpu.vector_store %arg3[%c0_3, %c0_4], %2 {strides = array<i32>} : memref<8x128xf32, #tpu.memory_space<vmem>>, vector<8x128xf32>,
    return
  }
  func.func @transform_0(%arg0: i32) -> (i32, i32) {
    %c0_i32 = arith.constant 0 : i32
    %c0_i32_0 = arith.constant 0 : i32
    %c0_i32_1 = arith.constant 0 : i32
    return %c0_i32, %c0_i32_0 : i32, i32
  }
  func.func @transform_1(%arg0: i32) -> (i32, i32) {
    %c0_i32 = arith.constant 0 : i32
    %c0_i32_0 = arith.constant 0 : i32
    return %arg0, %c0_i32 : i32, i32
  }
  func.func @transform_2(%arg0: i32) -> (i32, i32) {
    %c0_i32 = arith.constant 0 : i32
    %c0_i32_0 = arith.constant 0 : i32
    return %arg0, %c0_i32 : i32, i32
  }
}

module attributes {stable_mosaic.version = 11 : i64} {
  func.func @_cross_attn_ffn_kernel(%arg0: i32, %arg1: memref<1x8x32xf32, #tpu.memory_space<vmem>>, %arg2: memref<1x8x16xf32, #tpu.memory_space<vmem>>, %arg3: memref<1x8x16xf32, #tpu.memory_space<vmem>>, %arg4: memref<32x32xf32, #tpu.memory_space<vmem>>, %arg5: memref<1x32xf32, #tpu.memory_space<vmem>>, %arg6: memref<16x32xf32, #tpu.memory_space<vmem>>, %arg7: memref<1x32xf32, #tpu.memory_space<vmem>>, %arg8: memref<16x32xf32, #tpu.memory_space<vmem>>, %arg9: memref<1x32xf32, #tpu.memory_space<vmem>>, %arg10: memref<4x8x32xf32, #tpu.memory_space<vmem>>, %arg11: memref<1x32xf32, #tpu.memory_space<vmem>>, %arg12: memref<1x32xf32, #tpu.memory_space<vmem>>, %arg13: memref<1x32xf32, #tpu.memory_space<vmem>>, %arg14: memref<32x16xf32, #tpu.memory_space<vmem>>, %arg15: memref<1x16xf32, #tpu.memory_space<vmem>>, %arg16: memref<16x32xf32, #tpu.memory_space<vmem>>, %arg17: memref<1x32xf32, #tpu.memory_space<vmem>>, %arg18: memref<1x8x32xf32, #tpu.memory_space<vmem>>) attributes {dimension_semantics = [#tpu.dimension_semantics<parallel>], iteration_bounds = array<i64: 2>, scalar_prefetch = 0 : i64, scratch_operands = 0 : i64, tpu.core_type = #tpu.core_type<tc>, window_params = [{transform_indices = @transform_0, window_bounds = array<i64: 1, 8, 32>}, {transform_indices = @transform_1, window_bounds = array<i64: 1, 8, 16>}, {transform_indices = @transform_2, window_bounds = array<i64: 1, 8, 16>}, {pipeline_mode = #tpu.pipeline_mode<synchronous>, transform_indices = @transform_3, window_bounds = array<i64: 32, 32>}, {pipeline_mode = #tpu.pipeline_mode<synchronous>, transform_indices = @transform_4, window_bounds = array<i64: 1, 32>}, {pipeline_mode = #tpu.pipeline_mode<synchronous>, transform_indices = @transform_5, window_bounds = array<i64: 16, 32>}, {pipeline_mode = #tpu.pipeline_mode<synchronous>, transform_indices = @transform_6, window_bounds = array<i64: 1, 32>}, {pipeline_mode = #tpu.pipeline_mode<synchronous>, transform_indices = @transform_7, window_bounds = array<i64: 16, 32>}, {pipeline_mode = #tpu.pipeline_mode<synchronous>, transform_indices = @transform_8, window_bounds = array<i64: 1, 32>}, {pipeline_mode = #tpu.pipeline_mode<synchronous>, transform_indices = @transform_9, window_bounds = array<i64: 4, 8, 32>}, {pipeline_mode = #tpu.pipeline_mode<synchronous>, transform_indices = @transform_10, window_bounds = array<i64: 1, 32>}, {pipeline_mode = #tpu.pipeline_mode<synchronous>, transform_indices = @transform_11, window_bounds = array<i64: 1, 32>}, {pipeline_mode = #tpu.pipeline_mode<synchronous>, transform_indices = @transform_12, window_bounds = array<i64: 1, 32>}, {pipeline_mode = #tpu.pipeline_mode<synchronous>, transform_indices = @transform_13, window_bounds = array<i64: 32, 16>}, {pipeline_mode = #tpu.pipeline_mode<synchronous>, transform_indices = @transform_14, window_bounds = array<i64: 1, 16>}, {pipeline_mode = #tpu.pipeline_mode<synchronous>, transform_indices = @transform_15, window_bounds = array<i64: 16, 32>}, {pipeline_mode = #tpu.pipeline_mode<synchronous>, transform_indices = @transform_16, window_bounds = array<i64: 1, 32>}, {transform_indices = @transform_17, window_bounds = array<i64: 1, 8, 32>}]} {
    %c0 = arith.constant 0 : index
    %c0_0 = arith.constant 0 : index
    %c0_1 = arith.constant 0 : index
    %0 = vector.load %arg1[%c0, %c0_0, %c0_1] : memref<1x8x32xf32, #tpu.memory_space<vmem>>, vector<1x8x32xf32>
    %1 = vector.shape_cast %0 : vector<1x8x32xf32> to vector<8x32xf32>
    %2 = vector.shape_cast %0 : vector<1x8x32xf32> to vector<8x32xf32>
    %c0_2 = arith.constant 0 : index
    %c0_3 = arith.constant 0 : index
    %c0_4 = arith.constant 0 : index
    %3 = vector.load %arg2[%c0_2, %c0_3, %c0_4] : memref<1x8x16xf32, #tpu.memory_space<vmem>>, vector<1x8x16xf32>
    %4 = vector.shape_cast %3 : vector<1x8x16xf32> to vector<8x16xf32>
    %c0_5 = arith.constant 0 : index
    %c0_6 = arith.constant 0 : index
    %c0_7 = arith.constant 0 : index
    %5 = vector.load %arg3[%c0_5, %c0_6, %c0_7] : memref<1x8x16xf32, #tpu.memory_space<vmem>>, vector<1x8x16xf32>
    %6 = vector.shape_cast %5 : vector<1x8x16xf32> to vector<8x16xf32>
    %c0_8 = arith.constant 0 : index
    %c0_9 = arith.constant 0 : index
    %7 = vector.load %arg4[%c0_8, %c0_9] : memref<32x32xf32, #tpu.memory_space<vmem>>, vector<32x32xf32>
    %cst = arith.constant dense<0.000000e+00> : vector<8x32xf32>
    %8 = tpu.matmul %2, %7, %cst {dimension_numbers = #tpu.dot_dimension_numbers<[1], [0], [0], [1], [0, 0, 1, 1], [], []>} : vector<8x32xf32>, vector<32x32xf32>, vector<8x32xf32> -> vector<8x32xf32>
    %c0_10 = arith.constant 0 : index
    %c0_11 = arith.constant 0 : index
    %9 = vector.load %arg5[%c0_10, %c0_11] : memref<1x32xf32, #tpu.memory_space<vmem>>, vector<1x32xf32>
    %10 = vector.broadcast %9 : vector<1x32xf32> to vector<8x32xf32>
    %11 = arith.addf %8, %10 : vector<8x32xf32>
    %12 = vector.shape_cast %11 : vector<8x32xf32> to vector<1x8x32xf32>
    %c0_12 = arith.constant 0 : index
    %c0_13 = arith.constant 0 : index
    %13 = vector.load %arg6[%c0_12, %c0_13] : memref<16x32xf32, #tpu.memory_space<vmem>>, vector<16x32xf32>
    %cst_14 = arith.constant dense<0.000000e+00> : vector<8x32xf32>
    %14 = tpu.matmul %4, %13, %cst_14 {dimension_numbers = #tpu.dot_dimension_numbers<[1], [0], [0], [1], [0, 0, 1, 1], [], []>} : vector<8x16xf32>, vector<16x32xf32>, vector<8x32xf32> -> vector<8x32xf32>
    %c0_15 = arith.constant 0 : index
    %c0_16 = arith.constant 0 : index
    %15 = vector.load %arg7[%c0_15, %c0_16] : memref<1x32xf32, #tpu.memory_space<vmem>>, vector<1x32xf32>
    %16 = vector.broadcast %15 : vector<1x32xf32> to vector<8x32xf32>
    %17 = arith.addf %14, %16 : vector<8x32xf32>
    %18 = vector.shape_cast %17 : vector<8x32xf32> to vector<1x8x32xf32>
    %c0_17 = arith.constant 0 : index
    %c0_18 = arith.constant 0 : index
    %19 = vector.load %arg8[%c0_17, %c0_18] : memref<16x32xf32, #tpu.memory_space<vmem>>, vector<16x32xf32>
    %cst_19 = arith.constant dense<0.000000e+00> : vector<8x32xf32>
    %20 = tpu.matmul %6, %19, %cst_19 {dimension_numbers = #tpu.dot_dimension_numbers<[1], [0], [0], [1], [0, 0, 1, 1], [], []>} : vector<8x16xf32>, vector<16x32xf32>, vector<8x32xf32> -> vector<8x32xf32>
    %c0_20 = arith.constant 0 : index
    %c0_21 = arith.constant 0 : index
    %21 = vector.load %arg9[%c0_20, %c0_21] : memref<1x32xf32, #tpu.memory_space<vmem>>, vector<1x32xf32>
    %22 = vector.broadcast %21 : vector<1x32xf32> to vector<8x32xf32>
    %23 = arith.addf %20, %22 : vector<8x32xf32>
    %24 = vector.shape_cast %23 : vector<8x32xf32> to vector<1x8x32xf32>
    %25 = vector.extract_strided_slice %12 {offsets = [0, 0, 0], sizes = [1, 8, 8], strides = [1, 1, 1]} : vector<1x8x32xf32> to vector<1x8x8xf32>
    %26 = vector.extract_strided_slice %18 {offsets = [0, 0, 0], sizes = [1, 8, 8], strides = [1, 1, 1]} : vector<1x8x32xf32> to vector<1x8x8xf32>
    %27 = vector.extract_strided_slice %24 {offsets = [0, 0, 0], sizes = [1, 8, 8], strides = [1, 1, 1]} : vector<1x8x32xf32> to vector<1x8x8xf32>
    %cst_22 = arith.constant dense<0.000000e+00> : vector<1x8x8xf32>
    %28 = tpu.matmul %25, %26, %cst_22 {dimension_numbers = #tpu.dot_dimension_numbers<[2], [2], [1], [1], [0, 0, 0, 1, 1, 1], [0], [0]>} : vector<1x8x8xf32>, vector<1x8x8xf32>, vector<1x8x8xf32> -> vector<1x8x8xf32>
    %cst_23 = arith.constant dense<0xFF800000> : vector<1x8xf32>
    %29 = vector.multi_reduction <maximumf>, %28, %cst_23 [2] : vector<1x8x8xf32> to vector<1x8xf32>
    %30 = vector.shape_cast %29 : vector<1x8xf32> to vector<1x8x1xf32>
    %31 = vector.broadcast %30 : vector<1x8x1xf32> to vector<1x8x8xf32>
    %32 = arith.subf %28, %31 : vector<1x8x8xf32>
    %33 = math.exp %32 : vector<1x8x8xf32>
    %cst_24 = arith.constant dense<0.000000e+00> : vector<1x8xf32>
    %34 = vector.multi_reduction <add>, %33, %cst_24 [2] : vector<1x8x8xf32> to vector<1x8xf32>
    %35 = vector.shape_cast %34 : vector<1x8xf32> to vector<1x8x1xf32>
    %36 = tpu.reciprocal %35 : vector<1x8x1xf32> -> vector<1x8x1xf32>
    %37 = vector.broadcast %36 : vector<1x8x1xf32> to vector<1x8x8xf32>
    %38 = arith.mulf %33, %37 : vector<1x8x8xf32>
    %cst_25 = arith.constant dense<0.000000e+00> : vector<1x8x8xf32>
    %39 = tpu.matmul %38, %27, %cst_25 {dimension_numbers = #tpu.dot_dimension_numbers<[2], [1], [1], [2], [0, 0, 0, 1, 1, 2], [0], [0]>} : vector<1x8x8xf32>, vector<1x8x8xf32>, vector<1x8x8xf32> -> vector<1x8x8xf32>
    %40 = vector.shape_cast %39 : vector<1x8x8xf32> to vector<8x8xf32>
    %c0_26 = arith.constant 0 : index
    %c0_27 = arith.constant 0 : index
    %c0_28 = arith.constant 0 : index
    %41 = vector.load %arg10[%c0_26, %c0_27, %c0_28] : memref<4x8x32xf32, #tpu.memory_space<vmem>>, vector<1x8x32xf32>
    %42 = vector.shape_cast %41 : vector<1x8x32xf32> to vector<8x32xf32>
    %cst_29 = arith.constant dense<0.000000e+00> : vector<8x32xf32>
    %43 = tpu.matmul %40, %42, %cst_29 {dimension_numbers = #tpu.dot_dimension_numbers<[1], [0], [0], [1], [0, 0, 1, 1], [], []>} : vector<8x8xf32>, vector<8x32xf32>, vector<8x32xf32> -> vector<8x32xf32>
    %44 = vector.extract_strided_slice %12 {offsets = [0, 0, 8], sizes = [1, 8, 8], strides = [1, 1, 1]} : vector<1x8x32xf32> to vector<1x8x8xf32>
    %45 = vector.extract_strided_slice %18 {offsets = [0, 0, 8], sizes = [1, 8, 8], strides = [1, 1, 1]} : vector<1x8x32xf32> to vector<1x8x8xf32>
    %46 = vector.extract_strided_slice %24 {offsets = [0, 0, 8], sizes = [1, 8, 8], strides = [1, 1, 1]} : vector<1x8x32xf32> to vector<1x8x8xf32>
    %cst_30 = arith.constant dense<0.000000e+00> : vector<1x8x8xf32>
    %47 = tpu.matmul %44, %45, %cst_30 {dimension_numbers = #tpu.dot_dimension_numbers<[2], [2], [1], [1], [0, 0, 0, 1, 1, 1], [0], [0]>} : vector<1x8x8xf32>, vector<1x8x8xf32>, vector<1x8x8xf32> -> vector<1x8x8xf32>
    %cst_31 = arith.constant dense<0xFF800000> : vector<1x8xf32>
    %48 = vector.multi_reduction <maximumf>, %47, %cst_31 [2] : vector<1x8x8xf32> to vector<1x8xf32>
    %49 = vector.shape_cast %48 : vector<1x8xf32> to vector<1x8x1xf32>
    %50 = vector.broadcast %49 : vector<1x8x1xf32> to vector<1x8x8xf32>
    %51 = arith.subf %47, %50 : vector<1x8x8xf32>
    %52 = math.exp %51 : vector<1x8x8xf32>
    %cst_32 = arith.constant dense<0.000000e+00> : vector<1x8xf32>
    %53 = vector.multi_reduction <add>, %52, %cst_32 [2] : vector<1x8x8xf32> to vector<1x8xf32>
    %54 = vector.shape_cast %53 : vector<1x8xf32> to vector<1x8x1xf32>
    %55 = tpu.reciprocal %54 : vector<1x8x1xf32> -> vector<1x8x1xf32>
    %56 = vector.broadcast %55 : vector<1x8x1xf32> to vector<1x8x8xf32>
    %57 = arith.mulf %52, %56 : vector<1x8x8xf32>
    %cst_33 = arith.constant dense<0.000000e+00> : vector<1x8x8xf32>
    %58 = tpu.matmul %57, %46, %cst_33 {dimension_numbers = #tpu.dot_dimension_numbers<[2], [1], [1], [2], [0, 0, 0, 1, 1, 2], [0], [0]>} : vector<1x8x8xf32>, vector<1x8x8xf32>, vector<1x8x8xf32> -> vector<1x8x8xf32>
    %59 = vector.shape_cast %58 : vector<1x8x8xf32> to vector<8x8xf32>
    %c1 = arith.constant 1 : index
    %c0_34 = arith.constant 0 : index
    %c0_35 = arith.constant 0 : index
    %60 = vector.load %arg10[%c1, %c0_34, %c0_35] : memref<4x8x32xf32, #tpu.memory_space<vmem>>, vector<1x8x32xf32>
    %61 = vector.shape_cast %60 : vector<1x8x32xf32> to vector<8x32xf32>
    %cst_36 = arith.constant dense<0.000000e+00> : vector<8x32xf32>
    %62 = tpu.matmul %59, %61, %cst_36 {dimension_numbers = #tpu.dot_dimension_numbers<[1], [0], [0], [1], [0, 0, 1, 1], [], []>} : vector<8x8xf32>, vector<8x32xf32>, vector<8x32xf32> -> vector<8x32xf32>
    %63 = arith.addf %43, %62 : vector<8x32xf32>
    %64 = vector.extract_strided_slice %12 {offsets = [0, 0, 16], sizes = [1, 8, 8], strides = [1, 1, 1]} : vector<1x8x32xf32> to vector<1x8x8xf32>
    %65 = vector.extract_strided_slice %18 {offsets = [0, 0, 16], sizes = [1, 8, 8], strides = [1, 1, 1]} : vector<1x8x32xf32> to vector<1x8x8xf32>
    %66 = vector.extract_strided_slice %24 {offsets = [0, 0, 16], sizes = [1, 8, 8], strides = [1, 1, 1]} : vector<1x8x32xf32> to vector<1x8x8xf32>
    %cst_37 = arith.constant dense<0.000000e+00> : vector<1x8x8xf32>
    %67 = tpu.matmul %64, %65, %cst_37 {dimension_numbers = #tpu.dot_dimension_numbers<[2], [2], [1], [1], [0, 0, 0, 1, 1, 1], [0], [0]>} : vector<1x8x8xf32>, vector<1x8x8xf32>, vector<1x8x8xf32> -> vector<1x8x8xf32>
    %cst_38 = arith.constant dense<0xFF800000> : vector<1x8xf32>
    %68 = vector.multi_reduction <maximumf>, %67, %cst_38 [2] : vector<1x8x8xf32> to vector<1x8xf32>
    %69 = vector.shape_cast %68 : vector<1x8xf32> to vector<1x8x1xf32>
    %70 = vector.broadcast %69 : vector<1x8x1xf32> to vector<1x8x8xf32>
    %71 = arith.subf %67, %70 : vector<1x8x8xf32>
    %72 = math.exp %71 : vector<1x8x8xf32>
    %cst_39 = arith.constant dense<0.000000e+00> : vector<1x8xf32>
    %73 = vector.multi_reduction <add>, %72, %cst_39 [2] : vector<1x8x8xf32> to vector<1x8xf32>
    %74 = vector.shape_cast %73 : vector<1x8xf32> to vector<1x8x1xf32>
    %75 = tpu.reciprocal %74 : vector<1x8x1xf32> -> vector<1x8x1xf32>
    %76 = vector.broadcast %75 : vector<1x8x1xf32> to vector<1x8x8xf32>
    %77 = arith.mulf %72, %76 : vector<1x8x8xf32>
    %cst_40 = arith.constant dense<0.000000e+00> : vector<1x8x8xf32>
    %78 = tpu.matmul %77, %66, %cst_40 {dimension_numbers = #tpu.dot_dimension_numbers<[2], [1], [1], [2], [0, 0, 0, 1, 1, 2], [0], [0]>} : vector<1x8x8xf32>, vector<1x8x8xf32>, vector<1x8x8xf32> -> vector<1x8x8xf32>
    %79 = vector.shape_cast %78 : vector<1x8x8xf32> to vector<8x8xf32>
    %c2 = arith.constant 2 : index
    %c0_41 = arith.constant 0 : index
    %c0_42 = arith.constant 0 : index
    %80 = vector.load %arg10[%c2, %c0_41, %c0_42] : memref<4x8x32xf32, #tpu.memory_space<vmem>>, vector<1x8x32xf32>
    %81 = vector.shape_cast %80 : vector<1x8x32xf32> to vector<8x32xf32>
    %cst_43 = arith.constant dense<0.000000e+00> : vector<8x32xf32>
    %82 = tpu.matmul %79, %81, %cst_43 {dimension_numbers = #tpu.dot_dimension_numbers<[1], [0], [0], [1], [0, 0, 1, 1], [], []>} : vector<8x8xf32>, vector<8x32xf32>, vector<8x32xf32> -> vector<8x32xf32>
    %83 = arith.addf %63, %82 : vector<8x32xf32>
    %84 = vector.extract_strided_slice %12 {offsets = [0, 0, 24], sizes = [1, 8, 8], strides = [1, 1, 1]} : vector<1x8x32xf32> to vector<1x8x8xf32>
    %85 = vector.extract_strided_slice %18 {offsets = [0, 0, 24], sizes = [1, 8, 8], strides = [1, 1, 1]} : vector<1x8x32xf32> to vector<1x8x8xf32>
    %86 = vector.extract_strided_slice %24 {offsets = [0, 0, 24], sizes = [1, 8, 8], strides = [1, 1, 1]} : vector<1x8x32xf32> to vector<1x8x8xf32>
    %cst_44 = arith.constant dense<0.000000e+00> : vector<1x8x8xf32>
    %87 = tpu.matmul %84, %85, %cst_44 {dimension_numbers = #tpu.dot_dimension_numbers<[2], [2], [1], [1], [0, 0, 0, 1, 1, 1], [0], [0]>} : vector<1x8x8xf32>, vector<1x8x8xf32>, vector<1x8x8xf32> -> vector<1x8x8xf32>
    %cst_45 = arith.constant dense<0xFF800000> : vector<1x8xf32>
    %88 = vector.multi_reduction <maximumf>, %87, %cst_45 [2] : vector<1x8x8xf32> to vector<1x8xf32>
    %89 = vector.shape_cast %88 : vector<1x8xf32> to vector<1x8x1xf32>
    %90 = vector.broadcast %89 : vector<1x8x1xf32> to vector<1x8x8xf32>
    %91 = arith.subf %87, %90 : vector<1x8x8xf32>
    %92 = math.exp %91 : vector<1x8x8xf32>
    %cst_46 = arith.constant dense<0.000000e+00> : vector<1x8xf32>
    %93 = vector.multi_reduction <add>, %92, %cst_46 [2] : vector<1x8x8xf32> to vector<1x8xf32>
    %94 = vector.shape_cast %93 : vector<1x8xf32> to vector<1x8x1xf32>
    %95 = tpu.reciprocal %94 : vector<1x8x1xf32> -> vector<1x8x1xf32>
    %96 = vector.broadcast %95 : vector<1x8x1xf32> to vector<1x8x8xf32>
    %97 = arith.mulf %92, %96 : vector<1x8x8xf32>
    %cst_47 = arith.constant dense<0.000000e+00> : vector<1x8x8xf32>
    %98 = tpu.matmul %97, %86, %cst_47 {dimension_numbers = #tpu.dot_dimension_numbers<[2], [1], [1], [2], [0, 0, 0, 1, 1, 2], [0], [0]>} : vector<1x8x8xf32>, vector<1x8x8xf32>, vector<1x8x8xf32> -> vector<1x8x8xf32>
    %99 = vector.shape_cast %98 : vector<1x8x8xf32> to vector<8x8xf32>
    %c3 = arith.constant 3 : index
    %c0_48 = arith.constant 0 : index
    %c0_49 = arith.constant 0 : index
    %100 = vector.load %arg10[%c3, %c0_48, %c0_49] : memref<4x8x32xf32, #tpu.memory_space<vmem>>, vector<1x8x32xf32>
    %101 = vector.shape_cast %100 : vector<1x8x32xf32> to vector<8x32xf32>
    %cst_50 = arith.constant dense<0.000000e+00> : vector<8x32xf32>
    %102 = tpu.matmul %99, %101, %cst_50 {dimension_numbers = #tpu.dot_dimension_numbers<[1], [0], [0], [1], [0, 0, 1, 1], [], []>} : vector<8x8xf32>, vector<8x32xf32>, vector<8x32xf32> -> vector<8x32xf32>
    %103 = arith.addf %83, %102 : vector<8x32xf32>
    %c0_51 = arith.constant 0 : index
    %c0_52 = arith.constant 0 : index
    %104 = vector.load %arg11[%c0_51, %c0_52] : memref<1x32xf32, #tpu.memory_space<vmem>>, vector<1x32xf32>
    %105 = vector.broadcast %104 : vector<1x32xf32> to vector<8x32xf32>
    %106 = arith.addf %103, %105 : vector<8x32xf32>
    %c0_53 = arith.constant 0 : index
    %c0_54 = arith.constant 0 : index
    %107 = vector.load %arg12[%c0_53, %c0_54] : memref<1x32xf32, #tpu.memory_space<vmem>>, vector<1x32xf32>
    %c0_55 = arith.constant 0 : index
    %c0_56 = arith.constant 0 : index
    %108 = vector.load %arg13[%c0_55, %c0_56] : memref<1x32xf32, #tpu.memory_space<vmem>>, vector<1x32xf32>
    %109 = arith.addf %106, %1 : vector<8x32xf32>
    %cst_57 = arith.constant dense<0.000000e+00> : vector<8xf32>
    %110 = vector.multi_reduction <add>, %109, %cst_57 [1] : vector<8x32xf32> to vector<8xf32>
    %111 = vector.shape_cast %110 : vector<8xf32> to vector<8x1xf32>
    %cst_58 = arith.constant 3.200000e+01 : f32
    %112 = vector.broadcast %cst_58 : f32 to vector<8x1xf32>
    %113 = arith.divf %111, %112 : vector<8x1xf32>
    %114 = vector.broadcast %113 : vector<8x1xf32> to vector<8x32xf32>
    %115 = arith.subf %109, %114 : vector<8x32xf32>
    %116 = arith.mulf %115, %115 : vector<8x32xf32>
    %cst_59 = arith.constant dense<0.000000e+00> : vector<8xf32>
    %117 = vector.multi_reduction <add>, %116, %cst_59 [1] : vector<8x32xf32> to vector<8xf32>
    %118 = vector.shape_cast %117 : vector<8xf32> to vector<8x1xf32>
    %cst_60 = arith.constant 3.200000e+01 : f32
    %119 = vector.broadcast %cst_60 : f32 to vector<8x1xf32>
    %120 = arith.divf %118, %119 : vector<8x1xf32>
    %121 = vector.broadcast %113 : vector<8x1xf32> to vector<8x32xf32>
    %122 = arith.subf %109, %121 : vector<8x32xf32>
    %cst_61 = arith.constant 9.99999996E-13 : f32
    %123 = vector.broadcast %cst_61 : f32 to vector<8x1xf32>
    %124 = arith.addf %120, %123 : vector<8x1xf32>
    %125 = math.rsqrt %124 : vector<8x1xf32>
    %126 = vector.broadcast %125 : vector<8x1xf32> to vector<8x32xf32>
    %127 = arith.mulf %122, %126 : vector<8x32xf32>
    %128 = vector.broadcast %107 : vector<1x32xf32> to vector<8x32xf32>
    %129 = arith.mulf %127, %128 : vector<8x32xf32>
    %130 = vector.broadcast %108 : vector<1x32xf32> to vector<8x32xf32>
    %131 = arith.addf %129, %130 : vector<8x32xf32>
    %c0_62 = arith.constant 0 : index
    %c0_63 = arith.constant 0 : index
    %132 = vector.load %arg14[%c0_62, %c0_63] : memref<32x16xf32, #tpu.memory_space<vmem>>, vector<32x16xf32>
    %cst_64 = arith.constant dense<0.000000e+00> : vector<8x16xf32>
    %133 = tpu.matmul %131, %132, %cst_64 {dimension_numbers = #tpu.dot_dimension_numbers<[1], [0], [0], [1], [0, 0, 1, 1], [], []>} : vector<8x32xf32>, vector<32x16xf32>, vector<8x16xf32> -> vector<8x16xf32>
    %c0_65 = arith.constant 0 : index
    %c0_66 = arith.constant 0 : index
    %134 = vector.load %arg15[%c0_65, %c0_66] : memref<1x16xf32, #tpu.memory_space<vmem>>, vector<1x16xf32>
    %135 = vector.broadcast %134 : vector<1x16xf32> to vector<8x16xf32>
    %136 = arith.addf %133, %135 : vector<8x16xf32>
    %cst_67 = arith.constant 0.000000e+00 : f32
    %137 = vector.broadcast %cst_67 : f32 to vector<8x16xf32>
    %138 = arith.maximumf %136, %137 : vector<8x16xf32>
    %c0_68 = arith.constant 0 : index
    %c0_69 = arith.constant 0 : index
    %139 = vector.load %arg16[%c0_68, %c0_69] : memref<16x32xf32, #tpu.memory_space<vmem>>, vector<16x32xf32>
    %cst_70 = arith.constant dense<0.000000e+00> : vector<8x32xf32>
    %140 = tpu.matmul %138, %139, %cst_70 {dimension_numbers = #tpu.dot_dimension_numbers<[1], [0], [0], [1], [0, 0, 1, 1], [], []>} : vector<8x16xf32>, vector<16x32xf32>, vector<8x32xf32> -> vector<8x32xf32>
    %c0_71 = arith.constant 0 : index
    %c0_72 = arith.constant 0 : index
    %141 = vector.load %arg17[%c0_71, %c0_72] : memref<1x32xf32, #tpu.memory_space<vmem>>, vector<1x32xf32>
    %142 = vector.broadcast %141 : vector<1x32xf32> to vector<8x32xf32>
    %143 = arith.addf %140, %142 : vector<8x32xf32>
    %144 = arith.addf %143, %131 : vector<8x32xf32>
    %cst_73 = arith.constant dense<0.000000e+00> : vector<8xf32>
    %145 = vector.multi_reduction <add>, %144, %cst_73 [1] : vector<8x32xf32> to vector<8xf32>
    %146 = vector.shape_cast %145 : vector<8xf32> to vector<8x1xf32>
    %cst_74 = arith.constant 3.200000e+01 : f32
    %147 = vector.broadcast %cst_74 : f32 to vector<8x1xf32>
    %148 = arith.divf %146, %147 : vector<8x1xf32>
    %149 = vector.broadcast %148 : vector<8x1xf32> to vector<8x32xf32>
    %150 = arith.subf %144, %149 : vector<8x32xf32>
    %151 = arith.mulf %150, %150 : vector<8x32xf32>
    %cst_75 = arith.constant dense<0.000000e+00> : vector<8xf32>
    %152 = vector.multi_reduction <add>, %151, %cst_75 [1] : vector<8x32xf32> to vector<8xf32>
    %153 = vector.shape_cast %152 : vector<8xf32> to vector<8x1xf32>
    %cst_76 = arith.constant 3.200000e+01 : f32
    %154 = vector.broadcast %cst_76 : f32 to vector<8x1xf32>
    %155 = arith.divf %153, %154 : vector<8x1xf32>
    %156 = vector.broadcast %148 : vector<8x1xf32> to vector<8x32xf32>
    %157 = arith.subf %144, %156 : vector<8x32xf32>
    %cst_77 = arith.constant 9.99999996E-13 : f32
    %158 = vector.broadcast %cst_77 : f32 to vector<8x1xf32>
    %159 = arith.addf %155, %158 : vector<8x1xf32>
    %160 = math.rsqrt %159 : vector<8x1xf32>
    %161 = vector.broadcast %160 : vector<8x1xf32> to vector<8x32xf32>
    %162 = arith.mulf %157, %161 : vector<8x32xf32>
    %163 = vector.broadcast %107 : vector<1x32xf32> to vector<8x32xf32>
    %164 = arith.mulf %162, %163 : vector<8x32xf32>
    %165 = vector.broadcast %108 : vector<1x32xf32> to vector<8x32xf32>
    %166 = arith.addf %164, %165 : vector<8x32xf32>
    %167 = vector.shape_cast %166 : vector<8x32xf32> to vector<1x8x32xf32>
    %c0_78 = arith.constant 0 : index
    %c0_79 = arith.constant 0 : index
    %c0_80 = arith.constant 0 : index
    %168 = vector.load %arg18[%c0_78, %c0_79, %c0_80] : memref<1x8x32xf32, #tpu.memory_space<vmem>>, vector<1x8x32xf32>
    tpu.vector_store %arg18[%c0_78, %c0_79, %c0_80], %167 {strides = array<i32>} : memref<1x8x32xf32, #tpu.memory_space<vmem>>, vector<1x8x32xf32>,
    return
  }
  func.func @transform_0(%arg0: i32) -> (i32, i32, i32) {
    %c0_i32 = arith.constant 0 : i32
    %c0_i32_0 = arith.constant 0 : i32
    %c0_i32_1 = arith.constant 0 : i32
    return %arg0, %c0_i32, %c0_i32_0 : i32, i32, i32
  }
  func.func @transform_1(%arg0: i32) -> (i32, i32, i32) {
    %c0_i32 = arith.constant 0 : i32
    %c0_i32_0 = arith.constant 0 : i32
    %c0_i32_1 = arith.constant 0 : i32
    return %arg0, %c0_i32, %c0_i32_0 : i32, i32, i32
  }
  func.func @transform_2(%arg0: i32) -> (i32, i32, i32) {
    %c0_i32 = arith.constant 0 : i32
    %c0_i32_0 = arith.constant 0 : i32
    %c0_i32_1 = arith.constant 0 : i32
    return %arg0, %c0_i32, %c0_i32_0 : i32, i32, i32
  }
  func.func @transform_3(%arg0: i32) -> (i32, i32) {
    %c0_i32 = arith.constant 0 : i32
    %c0_i32_0 = arith.constant 0 : i32
    %c0_i32_1 = arith.constant 0 : i32
    return %c0_i32, %c0_i32_0 : i32, i32
  }
  func.func @transform_4(%arg0: i32) -> (i32, i32) {
    %c0_i32 = arith.constant 0 : i32
    %c0_i32_0 = arith.constant 0 : i32
    %c0_i32_1 = arith.constant 0 : i32
    return %c0_i32, %c0_i32_0 : i32, i32
  }
  func.func @transform_5(%arg0: i32) -> (i32, i32) {
    %c0_i32 = arith.constant 0 : i32
    %c0_i32_0 = arith.constant 0 : i32
    %c0_i32_1 = arith.constant 0 : i32
    return %c0_i32, %c0_i32_0 : i32, i32
  }
  func.func @transform_6(%arg0: i32) -> (i32, i32) {
    %c0_i32 = arith.constant 0 : i32
    %c0_i32_0 = arith.constant 0 : i32
    %c0_i32_1 = arith.constant 0 : i32
    return %c0_i32, %c0_i32_0 : i32, i32
  }
  func.func @transform_7(%arg0: i32) -> (i32, i32) {
    %c0_i32 = arith.constant 0 : i32
    %c0_i32_0 = arith.constant 0 : i32
    %c0_i32_1 = arith.constant 0 : i32
    return %c0_i32, %c0_i32_0 : i32, i32
  }
  func.func @transform_8(%arg0: i32) -> (i32, i32) {
    %c0_i32 = arith.constant 0 : i32
    %c0_i32_0 = arith.constant 0 : i32
    %c0_i32_1 = arith.constant 0 : i32
    return %c0_i32, %c0_i32_0 : i32, i32
  }
  func.func @transform_9(%arg0: i32) -> (i32, i32, i32) {
    %c0_i32 = arith.constant 0 : i32
    %c0_i32_0 = arith.constant 0 : i32
    %c0_i32_1 = arith.constant 0 : i32
    %c0_i32_2 = arith.constant 0 : i32
    return %c0_i32, %c0_i32_0, %c0_i32_1 : i32, i32, i32
  }
  func.func @transform_10(%arg0: i32) -> (i32, i32) {
    %c0_i32 = arith.constant 0 : i32
    %c0_i32_0 = arith.constant 0 : i32
    %c0_i32_1 = arith.constant 0 : i32
    return %c0_i32, %c0_i32_0 : i32, i32
  }
  func.func @transform_11(%arg0: i32) -> (i32, i32) {
    %c0_i32 = arith.constant 0 : i32
    %c0_i32_0 = arith.constant 0 : i32
    %c0_i32_1 = arith.constant 0 : i32
    return %c0_i32, %c0_i32_0 : i32, i32
  }
  func.func @transform_12(%arg0: i32) -> (i32, i32) {
    %c0_i32 = arith.constant 0 : i32
    %c0_i32_0 = arith.constant 0 : i32
    %c0_i32_1 = arith.constant 0 : i32
    return %c0_i32, %c0_i32_0 : i32, i32
  }
  func.func @transform_13(%arg0: i32) -> (i32, i32) {
    %c0_i32 = arith.constant 0 : i32
    %c0_i32_0 = arith.constant 0 : i32
    %c0_i32_1 = arith.constant 0 : i32
    return %c0_i32, %c0_i32_0 : i32, i32
  }
  func.func @transform_14(%arg0: i32) -> (i32, i32) {
    %c0_i32 = arith.constant 0 : i32
    %c0_i32_0 = arith.constant 0 : i32
    %c0_i32_1 = arith.constant 0 : i32
    return %c0_i32, %c0_i32_0 : i32, i32
  }
  func.func @transform_15(%arg0: i32) -> (i32, i32) {
    %c0_i32 = arith.constant 0 : i32
    %c0_i32_0 = arith.constant 0 : i32
    %c0_i32_1 = arith.constant 0 : i32
    return %c0_i32, %c0_i32_0 : i32, i32
  }
  func.func @transform_16(%arg0: i32) -> (i32, i32) {
    %c0_i32 = arith.constant 0 : i32
    %c0_i32_0 = arith.constant 0 : i32
    %c0_i32_1 = arith.constant 0 : i32
    return %c0_i32, %c0_i32_0 : i32, i32
  }
  func.func @transform_17(%arg0: i32) -> (i32, i32, i32) {
    %c0_i32 = arith.constant 0 : i32
    %c0_i32_0 = arith.constant 0 : i32
    %c0_i32_1 = arith.constant 0 : i32
    return %arg0, %c0_i32, %c0_i32_0 : i32, i32, i32
  }
}

</mosaic_0001>

<bundles_post_ra>
// kernel: tpu_custom_call.1
= control target key start
LH: loop header
LB: loop body
LE: loop exit
PB: predicated region body
PF: predicated region fallthrough
CT: control target
= control target key end

     0   :  { %7 = vsyncpa [#allocation3], 0  ;;  %s692_s0 = inlined_call_operand.hbm [shape: f32[8,128], index: 0, kind: input, shape index: {}]   ;;  %s693_s1 = inlined_call_operand.hbm [shape: f32[16,128], index: 1, kind: input, shape index: {}]   ;;  %s694_s2 = inlined_call_operand.hbm [shape: f32[16,128], index: 2, kind: output, shape index: {}]  }
   0x1   :  { %8 = vsyncpa [#allocation6], 0 }
   0x2   :  { %10 = vsyncpa [#allocation6 + $0x1], 0 }
   0x3   :  { %11 = vsyncpa [#allocation4], 0 }
   0x4   :  { %13 = vsyncpa [#allocation4 + $0x1], 0  ;;  %s491_s9 = smov 0   ;;  %s493_s10 = smov 0  }
   0x5   :  { %s495_s11 = smov 0   ;;  %s497_s12 = smov 0  }
   0x6 LB: > { %s512_s13 = sadd.s32 4294967295, %s471_s12   ;;  %s272_s14 = sadd.s32 4294967294, %s471_s12   ;;  %s471_s12 = sphi %s497_s12, %s718_s12   ;;  %s467_s11 = sphi %s495_s11, %s717_s11   ;;  %s463_s10 = sphi %s493_s10, %s716_s10   ;;  %s459_s9 = sphi %s491_s9, %s715_s9  }
   0x7   : > { %p60_p0 = scmp.ne.s32.totalorder %s463_s10, %s459_s9  ;;  %p695_p1 = scmp.eq.s32.totalorder %s512_s13, 0 }
   0x8   : > { %p90_p3 = scmp.eq.s32.totalorder %s272_s14, 1  ;;  %p273_p5 = scmp.ge.s32.totalorder %s471_s12, 1 }
   0x9   : > { %p521_p4 = por %p695_p1, %p60_p0  ;;  %p97_p7 = scmp.lt.s32.totalorder %s471_s12, 3 }
   0xa   : > { %p526_p6 = por %p90_p3, %p60_p0  ;;  %s473_s18 = smov [#allocation2]  }
   0xb   : > { %s698_s15 = scalar_select %p521_p4, 1, 0 }
   0xc   : > { %s699_s16 = scalar_select %p526_p6, 1, 0 }
   0xd   : > { %p531_p8 = pnand %p273_p5, %p97_p7  ;;  %s110_s19 = sshll.u32 %s473_s18, 4  ;;  %s111_s19 = int_to_ptr.vmem [resolvable:$true] %s110_s19 }
   0xe   : > { %s539_s20 = sadd.s32 1, %s471_s12   ;;  %s47_s24 = sadd.s32 1, %s467_s11 }
   0xf   : > { %s700_s17 = scalar_select %p531_p8, 1, 0 }
  0x10   : > { %p294_p10 = pneg %p531_p8  ;;  %s44_s22 = ssub.s32 %s471_s12, %s539_s20 }
  0x11   : > { %p549_p12 = scmp.eq.s32.totalorder %s44_s22, 0  ;;  %s343_s27 = scalar_lea.hbm %s692_s0, 128 }
  0x12   : > { %p543_p11 = pnand %p294_p10, %p695_p1  ;;  %p344_p0 = scmp.ne.s32.totalorder %s692_s0, %s343_s27 }
  0x13   : > { %s702_s23 = scalar_select %p549_p12, 1, 0 }
  0x14   : > { %p345_p3 = pneg %p543_p11  ;;  %p350_p10 = scmp.lt.u32.totalorder %s343_s27, %s692_s0 }
  0x16   : > { %p346_p5 = pnand %p345_p3, %p344_p0 }
  0x18   : > { %p347_p7 = pneg %p346_p5 }
  0x1a   : > { %p352_p9 = pnand %p350_p10, %p347_p7 }
  0x1c   : > { %355 = shalt.err (!%p352_p9)
}
  0x1d   : > { %s356_s4 = scalar_lea.vmem %s111_s19, 128  ;;  %p364_p6 = scmp.lt.s32.totalorder %s111_s19, %s111_s19 }
  0x1e   : > { %p357_p1 = scmp.ne.s32.totalorder %s111_s19, %s356_s4  ;;  %p365_p4 = scmp.lt.s32.totalorder %s356_s4, %s356_s4 }
  0x20   : > { %p359_p2 = pnand %p357_p1, %p345_p3  ;;  %p366_p8 = por %p365_p4, %p364_p6 }
  0x22   : > { %p360_p13 = pneg %p359_p2 }
  0x24   : > { %p367_p12 = pnand %p366_p8, %p360_p13 }
  0x26   : > { %370 = shalt.err (!%p367_p12)
}
  0x27   : > { %297 = dma.hbm_to_vmem [thread:$0]  (!%p543_p11), %s692_s0, 128, %s111_s19, [#allocation3]  }
  0x28   : > { %p703_p1 = scmp.ne.s32.totalorder %s702_s23, 0  ;;  %p55_p2 = scmp.eq.s32.totalorder %s471_s12, 0 }
  0x29   : > { %p704_p4 = scmp.ne.s32.totalorder %s467_s11, %s463_s10  ;;  %p705_p6 = scmp.eq.s32.totalorder %s512_s13, 1 }
  0x2a   : > { %s575_s7 = scalar_select %p703_p1, %s467_s11, %s47_s24  }
  0x2b   : > { %p583_p8 = por %p705_p6, %p704_p4  ;;  %p307_p9 = scmp.lt.s32.totalorder %s471_s12, 2 }
  0x2c   : > { %s121_s14 = sand.u32 1, %s467_s11   ;;  %p707_p12 = pmov %p704_p4 }
  0x2d   : > { %s276_s18 = sshll.u32 %s121_s14, 3  ;;  %s277_s21 = sshll.u32 %s471_s12, 7 }
  0x2e   : > { %p56_p13 = por %p55_p2, %p707_p12  ;;  %s596_s19 = scalar_lea.hbm %s693_s1, %s277_s21 }
  0x2f   : > { %s125_s23 = scalar_lea.vmem [#allocation5], %s276_s18  ;;  %s122_s27 = scalar_lea.sflag [#allocation6], %s121_s14 }
  0x30   : > { %s132_s24 = sshll.u32 %s125_s23, 4  ;;  %p598_p11 = pnand %p307_p9, %p56_p13  ;;  %s602_s24 = int_to_ptr.vmem [resolvable:$true] %s132_s24 }
  0x31   : > { %s371_s28 = scalar_lea.hbm %s596_s19, 128  ;;  %s376_s3 = scalar_lea.hbm %s693_s1, 256 }
  0x32   : > { %p372_p0 = scmp.ne.s32.totalorder %s596_s19, %s371_s28  ;;  %p373_p3 = pneg %p598_p11 }
  0x33   : > { %p377_p10 = scmp.lt.u32.totalorder %s596_s19, %s693_s1  ;;  %p378_p1 = scmp.lt.u32.totalorder %s376_s3, %s371_s28 }
  0x34   : > { %p374_p5 = pnand %p373_p3, %p372_p0  ;;  %p380_p4 = scmp.lt.u32.totalorder %s371_s28, %s596_s19 }
  0x35   : > { %p379_p2 = por %p378_p1, %p377_p10 }
  0x36   : > { %p375_p7 = pneg %p374_p5 }
  0x37   : > { %p381_p6 = por %p380_p4, %p379_p2 }
  0x39   : > { %p382_p9 = pnand %p381_p6, %p375_p7 }
  0x3b   : > { %385 = shalt.err (!%p382_p9)
}
  0x3c   : > { %s386_s6 = scalar_lea.vmem %s602_s24, 128  ;;  %s474_s14 = smov [#allocation5]  }
  0x3d   : > { %p387_p12 = scmp.ne.s32.totalorder %s602_s24, %s386_s6  ;;  %s391_s18 = sshll.u32 %s474_s14, 4  ;;  %s392_s18 = int_to_ptr.vmem [resolvable:$false] %s391_s18 }
  0x3e   : > { %s393_s21 = scalar_lea.vmem %s392_s18, 256  ;;  %p394_p5 = scmp.lt.s32.totalorder %s602_s24, %s392_s18 }
  0x3f   : > { %p389_p13 = pnand %p387_p12, %p373_p3  ;;  %p395_p10 = scmp.lt.s32.totalorder %s393_s21, %s386_s6 }
  0x41   : > { %p390_p0 = pneg %p389_p13  ;;  %p396_p1 = por %p395_p10, %p394_p5 }
  0x43   : > { %p397_p2 = pnand %p396_p1, %p390_p0 }
  0x45   : > { %400 = shalt.err (!%p397_p2)
}
  0x46   : > { %301 = dma.hbm_to_vmem [thread:$0]  (!%p598_p11), %s596_s19, 128, %s602_s24, %s122_s27  }
  0x47   : > { %p709_p7 = scmp.ne.s32.totalorder %s700_s17, 0 }
  0x48   : > { %p710_p3 = scmp.eq.s32.totalorder (!%p709_p7), %s512_s13, 0 }
  0x49   : > { %141 = sbr.rel (%p709_p7) target bundleno = 110 (0x6e), region = 28 }
  0x50   : > { %446 = dma.done.wait (%p710_p3), [#allocation3], 128   ;;  %p711_p4 = pmov %p710_p3 }
  0x51   : > { %s636_s22 = sand.u32 1, %s463_s10   ;;  %p712_p6 = scmp.ne.s32.totalorder %s698_s15, 0 }
  0x52   : > { %448 = vsyncadd (%p711_p4), [#allocation3], 4294967168  ;;  %s280_s25 = sshll.u32 %s636_s22, 3  ;;  %s148_s23 = scalar_lea.sflag [#allocation6], %s636_s22 }
  0x53   : > { %s151_s26 = scalar_lea.vmem [#allocation5], %s280_s25 }
  0x54   : > { %450 = dma.done.wait (%p712_p6), %s148_s23, 128  }
  0x55   : > { %452 = vsyncadd (%p712_p6), %s148_s23, 4294967168  ;;  %s171_s17 = scalar_lea.vmem [#allocation7], %s280_s25  ;;  %s283_s24 = sshll.u32 %s512_s13, 7  ;;  %v172_v0 = vld [vmem:[%s151_s26] sm:$0xff]  ;;  %v173_v1 = vld [vmem:[#allocation2] sm:$0xff] }
  0x56   : > { %s190_s19 = sshll.u32 %s171_s17, 4  ;;  %v174_v2 = vadd.f32 %v173_v1, %v172_v0  ;;  %s650_s29 = scalar_lea.hbm %s694_s2, %s283_s24  ;;  %s645_s19 = int_to_ptr.vmem [resolvable:$true] %s190_s19 }
  0x57   : > { %s177_s15 = scalar_lea.sflag [#allocation4], %s636_s22  ;;  %s401_s30 = scalar_lea.vmem %s645_s19, 128 }
  0x58   : > { %175 = vst [vmem:[%s171_s17] sm:$0xff] %v174_v2  ;;  %p402_p11 = scmp.ne.s32.totalorder %s645_s19, %s401_s30  ;;  %s475_s13 = smov [#allocation7]  }
  0x59   : > { %s405_s3 = sshll.u32 %s475_s13, 4  ;;  %s406_s3 = int_to_ptr.vmem [resolvable:$false] %s405_s3 }
  0x5a   : > { %p403_p9 = pnand %p402_p11, %p583_p8  ;;  %s407_s4 = scalar_lea.vmem %s406_s3, 256 }
  0x5b   : > { %p408_p13 = scmp.lt.s32.totalorder %s645_s19, %s406_s3  ;;  %p409_p0 = scmp.lt.s32.totalorder %s407_s4, %s401_s30 }
  0x5c   : > { %p404_p12 = pneg %p403_p9 }
  0x5d   : > { %p410_p5 = por %p409_p0, %p408_p13 }
  0x5f   : > { %p411_p10 = pnand %p410_p5, %p404_p12 }
  0x61   : > { %414 = shalt.err (!%p411_p10)
}
  0x62   : > { %s415_s5 = scalar_lea.hbm %s650_s29, 128  ;;  %s419_s18 = scalar_lea.hbm %s694_s2, 256 }
  0x63   : > { %p416_p1 = scmp.ne.s32.totalorder %s650_s29, %s415_s5  ;;  %p420_p3 = scmp.lt.u32.totalorder %s650_s29, %s694_s2 }
  0x64   : > { %p421_p4 = scmp.lt.u32.totalorder %s419_s18, %s415_s5  ;;  %p423_p11 = scmp.lt.u32.totalorder %s415_s5, %s650_s29 }
  0x65   : > { %p417_p2 = pnand %p416_p1, %p583_p8 }
  0x66   : > { %p422_p6 = por %p421_p4, %p420_p3 }
  0x67   : > { %p418_p7 = pneg %p417_p2 }
  0x68   : > { %p424_p9 = por %p423_p11, %p422_p6 }
  0x6a   : > { %p425_p12 = pnand %p424_p9, %p418_p7 }
  0x6c   : > { %428 = shalt.err (!%p425_p12)
}
  0x6d   : > { %292 = dma.vmem_to_hbm [thread:$0]  (%p583_p8), %s645_s19, 128, %s650_s29, %s177_s15  }
  0x6e PF: > { %s202_s25 = sand.u32 1, %s459_s9   ;;  %p713_p13 = scmp.ne.s32.totalorder %s699_s16, 0 }
  0x6f   : > { %p714_p0 = scmp.ge.s32.totalorder %s471_s12, 2  ;;  %s203_s23 = scalar_lea.sflag [#allocation4], %s202_s25 }
  0x71   : > { %p303_p5 = pnand %p714_p0, %p713_p13 }
  0x73   : > { %454 = dma.done.wait (!%p303_p5), %s203_s23, 128  }
  0x74   : > { %456 = vsyncadd (!%p303_p5), %s203_s23, 4294967168  ;;  %p16_p10 = scmp.ge.s32.totalorder %s539_s20, 4   ;;  %s715_s9 = smov %s463_s10 }
  0x75   : > { %s716_s10 = smov %s467_s11  ;;  %s717_s11 = smov %s575_s7 }
  0x76   : > { %s718_s12 = smov %s539_s20  ;;  %18 = sbr.rel (!%p16_p10) target bundleno = 6 (0x6), region = 78 }
  0x7d   :  { %208 = vsyncpa [#allocation3], 1 }
  0x7e   :  { %210 = vsyncpa [#allocation3 + $0x1], 1 }
  0x7f   :  { %211 = vsyncpa [#allocation6], 1 }
  0x80   :  { %213 = vsyncpa [#allocation6 + $0x1], 1 }
  0x81   :  { %214 = vsyncpa [#allocation4], 1 }
  0x82   :  { %216 = vsyncpa [#allocation4 + $0x1], 1 }

// kernel: tpu_custom_call.1
= control target key start
LH: loop header
LB: loop body
LE: loop exit
PB: predicated region body
PF: predicated region fallthrough
CT: control target
= control target key end

     0   :  { %s3809_s0 = inlined_call_operand.hbm [shape: f32[2,8,32], index: 0, kind: input, shape index: {}]   ;;  %s3810_s1 = inlined_call_operand.hbm [shape: f32[2,8,16], index: 1, kind: input, shape index: {}]   ;;  %s3811_s2 = inlined_call_operand.hbm [shape: f32[2,8,16], index: 2, kind: input, shape index: {}]   ;;  %s3812_s3 = inlined_call_operand.vmem [shape: f32[32,32], index: 3, kind: input, shape index: {}]   ;;  %s3813_s4 = inlined_call_operand.vmem [shape: f32[1,32], index: 4, kind: input, shape index: {}]   ;;  %s3814_s5 = inlined_call_operand.hbm [shape: f32[16,32], index: 5, kind: input, shape index: {}]   ;;  %s3815_s6 = inlined_call_operand.hbm [shape: f32[1,32], index: 6, kind: input, shape index: {}]   ;;  %s3816_s7 = inlined_call_operand.hbm [shape: f32[16,32], index: 7, kind: input, shape index: {}]   ;;  %s3817_s8 = inlined_call_operand.hbm [shape: f32[1,32], index: 8, kind: input, shape index: {}]   ;;  %s3818_s9 = inlined_call_operand.vmem [shape: f32[4,8,32], index: 9, kind: input, shape index: {}]   ;;  %s3819_s10 = inlined_call_operand.hbm [shape: f32[1,32], index: 10, kind: input, shape index: {}]   ;;  %s3820_s11 = inlined_call_operand.hbm [shape: f32[1,32], index: 11, kind: input, shape index: {}]   ;;  %s3821_s12 = inlined_call_operand.hbm [shape: f32[1,32], index: 12, kind: input, shape index: {}]   ;;  %s3822_s13 = inlined_call_operand.vmem [shape: f32[32,16], index: 13, kind: input, shape index: {}]   ;;  %s3823_s14 = inlined_call_operand.vmem [shape: f32[1,16], index: 14, kind: input, shape index: {}]   ;;  %s3824_s15 = inlined_call_operand.vmem [shape: f32[16,32], index: 15, kind: input, shape index: {}]   ;;  %s3825_s16 = inlined_call_operand.vmem [shape: f32[1,32], index: 16, kind: input, shape index: {}]   ;;  %s3826_s17 = inlined_call_operand.hbm [shape: f32[2,8,32], index: 17, kind: output, shape index: {}]  }
   0x1   :  { %3854 = sst [smem:[#allocation33_spill]] %s3809_s0 }
   0x2   :  { %3855 = sst [smem:[#allocation34_spill]] %s3810_s1 }
   0x3   :  { %3856 = sst [smem:[#allocation35_spill]] %s3813_s4 }
   0x4   :  { %3857 = sst [smem:[#allocation36_spill]] %s3814_s5 }
   0x5   :  { %3858 = sst [smem:[#allocation37_spill]] %s3816_s7 }
   0x6   :  { %3859 = sst [smem:[#allocation38_spill]] %s3818_s9 }
   0x7   :  { %3860 = sst [smem:[#allocation39_spill]] %s3819_s10 }
   0x8   :  { %3861 = sst [smem:[#allocation40_spill]] %s3822_s13 }
   0x9   :  { %3862 = sst [smem:[#allocation41_spill]] %s3823_s14 }
   0xa   :  { %3863 = sst [smem:[#allocation42_spill]] %s3824_s15 }
   0xb   :  { %3864 = sst [smem:[#allocation43_spill]] %s3825_s16 }
   0xc   :  { %3865 = sst [smem:[#allocation44_spill]] %s3826_s17 }
   0xd   :  { %22 = vsyncpa [#allocation3], 0 }
   0xe   :  { %24 = vsyncpa [#allocation3 + $0x1], 0 }
   0xf   :  { %25 = vsyncpa [#allocation6], 0 }
  0x10   :  { %27 = vsyncpa [#allocation6 + $0x1], 0 }
  0x11   :  { %28 = vsyncpa [#allocation9], 0 }
  0x12   :  { %29 = vsyncpa [#allocation12], 0 }
  0x13   :  { %30 = vsyncpa [#allocation15], 0 }
  0x14   :  { %31 = vsyncpa [#allocation18], 0 }
  0x15   :  { %32 = vsyncpa [#allocation4], 0 }
  0x16   :  { %34 = vsyncpa [#allocation4 + $0x1], 0  ;;  %s3224_s24 = smov 0   ;;  %s3226_s25 = smov 0  }
  0x17   :  { %s3228_s26 = smov 0   ;;  %s3230_s27 = smov 0  }
  0x18 LB: > { %3866 = sst [smem:[#allocation27_spill]] %s3101_s24  ;;  %s3115_s28 = smov [#allocation8]   ;;  %s3113_s27 = sphi %s3230_s27, %s3916_s27   ;;  %s3109_s26 = sphi %s3228_s26, %s3920_s26   ;;  %s3105_s25 = sphi %s3226_s25, %s3919_s25   ;;  %s3101_s24 = sphi %s3224_s24, %s3918_s24  }
  0x19   : > { %3867 = sst [smem:[#allocation28_spill]] %s3113_s27  ;;  %s461_s29 = sshll.u32 %s3115_s28, 4  ;;  %s3250_s29 = int_to_ptr.vmem [resolvable:$true] %s461_s29 }
  0x1a   : > { %s3245_s0 = sadd.s32 4294967295, %s3113_s27   ;;  %p2356_p0 = scmp.ge.s32.totalorder %s3113_s27, 1 }
  0x1b   : > { %p3838_p1 = scmp.eq.s32.totalorder %s3245_s0, 0  ;;  %p443_p2 = scmp.lt.s32.totalorder %s3113_s27, 3 }
  0x1c   : > { %s3116_s18 = smov [#allocation11]   ;;  %s3117_s20 = smov [#allocation14]  }
  0x1d   : > { %p3252_p3 = pnand %p2356_p0, %p443_p2  ;;  %s485_s19 = sshll.u32 %s3116_s18, 4  ;;  %s3265_s19 = int_to_ptr.vmem [resolvable:$true] %s485_s19 }
  0x1e   : > { %s513_s21 = sshll.u32 %s3117_s20, 4  ;;  %s3870_s5 = sld [smem:[#allocation36_spill]]  ;;  %s3267_s21 = int_to_ptr.vmem [resolvable:$true] %s513_s21 }
  0x1f   : > { %s3868_s30 = scalar_select %p3252_p3, 1, 0 }
  0x20   : > { %p2622_p5 = pneg %p3252_p3 }
  0x22   : > { %p3261_p6 = pnand %p2622_p5, %p3838_p1 }
  0x24   : > { %s3869_s1 = scalar_select %p3261_p6, 1, 0 }
  0x25   : > { %s2741_s28 = scalar_lea.hbm %s3870_s5, 256  ;;  %p3277_p8 = pneg %p3261_p6 }
  0x26   : > { %p2742_p7 = scmp.ne.s32.totalorder %s3870_s5, %s2741_s28  ;;  %p2748_p11 = scmp.lt.u32.totalorder %s2741_s28, %s3870_s5 }
  0x27   : > { %s3871_s18 = scalar_select %p3277_p8, 1, 0 }
  0x28   : > { %p2744_p9 = pnand %p3277_p8, %p2742_p7 }
  0x2a   : > { %p2745_p10 = pneg %p2744_p9 }
  0x2c   : > { %p2750_p12 = pnand %p2748_p11, %p2745_p10 }
  0x2e   : > { %2753 = shalt.err (!%p2750_p12)
}
  0x2f   : > { %s2754_s16 = scalar_lea.vmem %s3250_s29, 256  ;;  %p2762_p5 = scmp.lt.s32.totalorder %s3250_s29, %s3250_s29 }
  0x30   : > { %p2755_p13 = scmp.ne.s32.totalorder %s3250_s29, %s2754_s16  ;;  %p2763_p4 = scmp.lt.s32.totalorder %s2754_s16, %s2754_s16 }
  0x32   : > { %p2757_p0 = pnand %p2755_p13, %p3277_p8  ;;  %p2764_p7 = por %p2763_p4, %p2762_p5 }
  0x34   : > { %p2758_p2 = pneg %p2757_p0 }
  0x36   : > { %p2765_p9 = pnand %p2764_p7, %p2758_p2 }
  0x38   : > { %2768 = shalt.err (!%p2765_p9)
}
  0x39   : > { %s3118_s17 = smov 128   ;;  %s3119_s14 = smov 8  }
  0x3a   : > { %2625 = dma.hbm_to_vmem [thread:$0]  (!%p3261_p6), %s3870_s5, 256, %s3250_s29, [#allocation9], %s3118_s17, %s3118_s17, %s3119_s14  }
  0x3b   : > { %s3872_s7 = sld [smem:[#allocation37_spill]] }
  0x41   : > { %s2769_s15 = scalar_lea.hbm %s3872_s7, 256 }
  0x42   : > { %p2770_p4 = scmp.ne.s32.totalorder %s3872_s7, %s2769_s15  ;;  %p2776_p12 = scmp.lt.u32.totalorder %s2769_s15, %s3872_s7 }
  0x44   : > { %p2772_p10 = pnand %p2770_p4, %p3277_p8 }
  0x46   : > { %p2773_p11 = pneg %p2772_p10 }
  0x48   : > { %p2778_p13 = pnand %p2776_p12, %p2773_p11 }
  0x4a   : > { %2781 = shalt.err (!%p2778_p13)
}
  0x4b   : > { %s2782_s29 = scalar_lea.vmem %s3265_s19, 256  ;;  %p2790_p7 = scmp.lt.s32.totalorder %s3265_s19, %s3265_s19 }
  0x4c   : > { %p2783_p0 = scmp.ne.s32.totalorder %s3265_s19, %s2782_s29  ;;  %p2791_p9 = scmp.lt.s32.totalorder %s2782_s29, %s2782_s29 }
  0x4e   : > { %p2785_p2 = pnand %p2783_p0, %p3277_p8  ;;  %p2792_p4 = por %p2791_p9, %p2790_p7 }
  0x50   : > { %p2786_p5 = pneg %p2785_p2 }
  0x52   : > { %p2793_p10 = pnand %p2792_p4, %p2786_p5 }
  0x54   : > { %2796 = shalt.err (!%p2793_p10)
}
  0x55   : > { %2631 = dma.hbm_to_vmem [thread:$0]  (!%p3261_p6), %s3872_s7, 256, %s3265_s19, [#allocation12], %s3118_s17, %s3118_s17, %s3119_s14  }
  0x56   : > { %s3873_s10 = sld [smem:[#allocation39_spill]] }
  0x5c   : > { %s2797_s22 = scalar_lea.hbm %s3873_s10, 16 }
  0x5d   : > { %p2798_p11 = scmp.ne.s32.totalorder %s3873_s10, %s2797_s22  ;;  %p2804_p0 = scmp.lt.u32.totalorder %s2797_s22, %s3873_s10 }
  0x5f   : > { %p2800_p12 = pnand %p2798_p11, %p3277_p8 }
  0x61   : > { %p2801_p13 = pneg %p2800_p12 }
  0x63   : > { %p2806_p2 = pnand %p2804_p0, %p2801_p13 }
  0x65   : > { %2809 = shalt.err (!%p2806_p2)
}
  0x66   : > { %s2810_s19 = scalar_lea.vmem %s3267_s21, 16  ;;  %s2817_s17 = scalar_lea.vmem %s3267_s21, 32 }
  0x67   : > { %p2811_p5 = scmp.ne.s32.totalorder %s3267_s21, %s2810_s19  ;;  %p2818_p4 = scmp.lt.s32.totalorder %s3267_s21, %s3267_s21 }
  0x68   : > { %p2819_p10 = scmp.lt.s32.totalorder %s2817_s17, %s2810_s19 }
  0x69   : > { %p2813_p7 = pnand %p2811_p5, %p3277_p8 }
  0x6a   : > { %p2820_p11 = por %p2819_p10, %p2818_p4 }
  0x6b   : > { %p2814_p9 = pneg %p2813_p7 }
  0x6d   : > { %p2821_p12 = pnand %p2820_p11, %p2814_p9 }
  0x6f   : > { %2824 = shalt.err (!%p2821_p12)
}
  0x70   : > { %2637 = dma.hbm_to_vmem [thread:$0]  (!%p3261_p6), %s3873_s10, 16, %s3267_s21, [#allocation15]  }
  0x71   : > { %s2355_s4 = sadd.s32 4294967294, %s3113_s27   ;;  %s3347_s9 = sadd.s32 1, %s3113_s27  }
  0x72   : > { %3874 = sst [smem:[#allocation29_spill]] %s3347_s9  ;;  %s47_s13 = sadd.s32 1, %s3109_s26 }
  0x73   : > { %s44_s15 = ssub.s32 %s3113_s27, %s3347_s9  ;;  %p54_p13 = scmp.ne.s32.totalorder %s3109_s26, %s3105_s25 }
  0x74   : > { %p45_p0 = scmp.eq.s32.totalorder %s44_s15, 0  ;;  %p55_p2 = scmp.eq.s32.totalorder %s3113_s27, 0 }
  0x75   : > { %p60_p5 = scmp.ne.s32.totalorder %s3105_s25, %s3101_s24  ;;  %p430_p7 = scmp.eq.s32.totalorder %s3245_s0, 1 }
  0x76   : > { %s3359_s22 = scalar_select %p45_p0, %s3109_s26, %s47_s13  }
  0x77   : > { %p56_p9 = por %p55_p2, %p54_p13  ;;  %p3363_p4 = por %p3838_p1, %p60_p5 }
  0x78   : > { %3875 = sst [smem:[#allocation30_spill]] %s3359_s22  ;;  %p3367_p10 = por %p430_p7, %p54_p13 }
  0x79   : > { %s3876_s21 = scalar_select %p3363_p4, 1, 0 }
  0x7a   : > { %s3877_s23 = scalar_select %p3367_p10, 1, 0 }
  0x7b   : > { %p436_p11 = scmp.eq.s32.totalorder %s2355_s4, 1  ;;  %p2665_p12 = scmp.lt.s32.totalorder %s3113_s27, 2 }
  0x7c   : > { %3878 = sst [smem:[#allocation31_spill]] %s3877_s23  ;;  %s3834_s28 = sand.u32 1, %s3109_s26  }
  0x7d   : > { %p3373_p3 = por %p436_p11, %p60_p5  ;;  %s3379_s16 = sshll.u32 %s3834_s28, 3 }
  0x7e   : > { %s3382_s19 = sshll.u32 %s3113_s27, 7  ;;  %p3384_p0 = pnand %p2665_p12, %p56_p9 }
  0x7f   : > { %s3879_s20 = scalar_select %p3373_p3, 1, 0 }
  0x80   : > { %s3881_s17 = scalar_select %p3384_p0, 1, 0 }
  0x81   : > { %3880 = sst [smem:[#allocation32_spill]] %s3879_s20  ;;  %s576_s14 = sand.u32 1, %s3113_s27  }
  0x82   : > { %s3882_s13 = sld [smem:[#allocation34_spill]]  ;;  %s580_s28 = scalar_lea.vmem [#allocation5], %s3379_s16 }
  0x83   : > { %s587_s5 = sshll.u32 %s580_s28, 4  ;;  %s3398_s7 = scalar_lea.sflag [#allocation6], %s576_s14  ;;  %s3396_s5 = int_to_ptr.vmem [resolvable:$true] %s587_s5 }
  0x84   : > { %p3404_p2 = pneg %p3384_p0 }
  0x86   : > { %s3883_s22 = scalar_select %p3404_p2, 1, 0 }
  0x88   : > { %s3393_s15 = scalar_lea.hbm %s3882_s13, %s3382_s19  ;;  %s2830_s9 = scalar_lea.hbm %s3882_s13, 256 }
  0x89   : > { %s2825_s10 = scalar_lea.hbm %s3393_s15, 128  ;;  %p2831_p9 = scmp.lt.u32.totalorder %s3393_s15, %s3882_s13 }
  0x8a   : > { %p2826_p13 = scmp.ne.s32.totalorder %s3393_s15, %s2825_s10  ;;  %p2832_p11 = scmp.lt.u32.totalorder %s2830_s9, %s2825_s10 }
  0x8b   : > { %p2834_p1 = scmp.lt.u32.totalorder %s2825_s10, %s3393_s15 }
  0x8c   : > { %p2828_p5 = pnand %p3404_p2, %p2826_p13  ;;  %p2833_p12 = por %p2832_p11, %p2831_p9 }
  0x8e   : > { %p2829_p7 = pneg %p2828_p5  ;;  %p2835_p3 = por %p2834_p1, %p2833_p12 }
  0x90   : > { %p2836_p10 = pnand %p2835_p3, %p2829_p7 }
  0x92   : > { %2839 = shalt.err (!%p2836_p10)
}
  0x93   : > { %s2840_s14 = scalar_lea.vmem %s3396_s5, 128  ;;  %s3120_s29 = smov [#allocation5]  }
  0x94   : > { %p2841_p13 = scmp.ne.s32.totalorder %s3396_s5, %s2840_s14  ;;  %s2845_s4 = sshll.u32 %s3120_s29, 4  ;;  %s2846_s4 = int_to_ptr.vmem [resolvable:$false] %s2845_s4 }
  0x95   : > { %s2847_s27 = scalar_lea.vmem %s2846_s4, 256  ;;  %p2848_p6 = scmp.lt.s32.totalorder %s3396_s5, %s2846_s4 }
  0x96   : > { %p2843_p5 = pnand %p2841_p13, %p3404_p2  ;;  %p2849_p8 = scmp.lt.s32.totalorder %s2847_s27, %s2840_s14 }
  0x98   : > { %p2844_p4 = pneg %p2843_p5  ;;  %p2850_p9 = por %p2849_p8, %p2848_p6 }
  0x9a   : > { %p2851_p11 = pnand %p2850_p9, %p2844_p4 }
  0x9c   : > { %2854 = shalt.err (!%p2851_p11)
}
  0x9d   : > { %2650 = dma.hbm_to_vmem [thread:$0]  (!%p3384_p0), %s3393_s15, 128, %s3396_s5, %s3398_s7  }
  0x9e   : > { %s3121_s10 = smov [#allocation10]   ;;  %s3122_s28 = smov [#allocation13]  }
  0x9f   : > { %s475_s9 = sshll.u32 %s3121_s10, 4  ;;  %s499_s13 = sshll.u32 %s3122_s28, 4  ;;  %s476_s9 = int_to_ptr.vmem [resolvable:$true] %s475_s9  ;;  %s500_s13 = int_to_ptr.vmem [resolvable:$true] %s499_s13 }
  0xa0   : > { %s2855_s4 = scalar_lea.hbm %s3815_s6, 16  ;;  %p3884_p3 = scmp.ne.s32.totalorder %s3871_s18, 0 }
  0xa1   : > { %p2856_p1 = scmp.ne.s32.totalorder %s3815_s6, %s2855_s4  ;;  %p2862_p4 = scmp.lt.u32.totalorder %s2855_s4, %s3815_s6 }
  0xa3   : > { %p2858_p6 = pnand %p2856_p1, %p3884_p3 }
  0xa5   : > { %p2859_p8 = pneg %p2858_p6 }
  0xa7   : > { %p2864_p10 = pnand %p2862_p4, %p2859_p8 }
  0xa9   : > { %2867 = shalt.err (!%p2864_p10)
}
  0xaa   : > { %s2868_s5 = scalar_lea.vmem %s476_s9, 16  ;;  %s2875_s20 = scalar_lea.vmem %s476_s9, 32 }
  0xab   : > { %p2869_p7 = scmp.ne.s32.totalorder %s476_s9, %s2868_s5  ;;  %p2876_p5 = scmp.lt.s32.totalorder %s476_s9, %s476_s9 }
  0xac   : > { %p2877_p9 = scmp.lt.s32.totalorder %s2875_s20, %s2868_s5 }
  0xad   : > { %p2871_p12 = pnand %p2869_p7, %p3884_p3 }
  0xae   : > { %p2878_p11 = por %p2877_p9, %p2876_p5 }
  0xaf   : > { %p2872_p13 = pneg %p2871_p12 }
  0xb1   : > { %p2879_p0 = pnand %p2878_p11, %p2872_p13 }
  0xb3   : > { %2882 = shalt.err (!%p2879_p0)
}
  0xb4   : > { %p3885_p1 = scmp.ne.s32.totalorder %s3869_s1, 0  ;;  %s2883_s28 = scalar_lea.hbm %s3817_s8, 16 }
  0xb5   : > { %p2884_p6 = scmp.ne.s32.totalorder %s3817_s8, %s2883_s28  ;;  %p2890_p0 = scmp.lt.u32.totalorder %s2883_s28, %s3817_s8 }
  0xb6   : > { %2628 = dma.hbm_to_vmem [thread:$0]  (!%p3885_p1), %s3815_s6, 16, %s476_s9, [#allocation9]  }
  0xb7   : > { %p2886_p8 = pnand %p2884_p6, %p3884_p3 }
  0xb9   : > { %p2887_p4 = pneg %p2886_p8 }
  0xbb   : > { %p2892_p10 = pnand %p2890_p0, %p2887_p4 }
  0xbd   : > { %2895 = shalt.err (!%p2892_p10)
}
  0xbe   : > { %s2896_s5 = scalar_lea.vmem %s500_s13, 16  ;;  %s2903_s9 = scalar_lea.vmem %s500_s13, 32 }
  0xbf   : > { %p2897_p7 = scmp.ne.s32.totalorder %s500_s13, %s2896_s5  ;;  %p2904_p5 = scmp.lt.s32.totalorder %s500_s13, %s500_s13 }
  0xc0   : > { %p2905_p9 = scmp.lt.s32.totalorder %s2903_s9, %s2896_s5 }
  0xc1   : > { %p2899_p12 = pnand %p2897_p7, %p3884_p3 }
  0xc2   : > { %p2906_p11 = por %p2905_p9, %p2904_p5 }
  0xc3   : > { %p2900_p13 = pneg %p2899_p12 }
  0xc5   : > { %p2907_p2 = pnand %p2906_p11, %p2900_p13 }
  0xc7   : > { %2910 = shalt.err (!%p2907_p2)
}
  0xc8   : > { %2634 = dma.hbm_to_vmem [thread:$0]  (!%p3885_p1), %s3817_s8, 16, %s500_s13, [#allocation12]  }
  0xc9   : > { %s3123_s10 = smov [#allocation16]   ;;  %s3124_s23 = smov [#allocation17]  }
  0xca   : > { %s524_s24 = sshll.u32 %s3123_s10, 4  ;;  %s535_s28 = sshll.u32 %s3124_s23, 4  ;;  %s525_s24 = int_to_ptr.vmem [resolvable:$true] %s524_s24  ;;  %s536_s28 = int_to_ptr.vmem [resolvable:$true] %s535_s28 }
  0xcb   : > { %s2911_s14 = scalar_lea.hbm %s3820_s11, 16 }
  0xcc   : > { %p2912_p2 = scmp.ne.s32.totalorder %s3820_s11, %s2911_s14  ;;  %p2918_p4 = scmp.lt.u32.totalorder %s2911_s14, %s3820_s11 }
  0xce   : > { %p2914_p6 = pnand %p2912_p2, %p3884_p3 }
  0xd0   : > { %p2915_p8 = pneg %p2914_p6 }
  0xd2   : > { %p2920_p0 = pnand %p2918_p4, %p2915_p8 }
  0xd4   : > { %2923 = shalt.err (!%p2920_p0)
}
  0xd5   : > { %s2924_s13 = scalar_lea.vmem %s525_s24, 16  ;;  %s2931_s15 = scalar_lea.vmem %s525_s24, 32 }
  0xd6   : > { %p2925_p10 = scmp.ne.s32.totalorder %s525_s24, %s2924_s13  ;;  %p2932_p13 = scmp.lt.s32.totalorder %s525_s24, %s525_s24 }
  0xd7   : > { %p2933_p5 = scmp.lt.s32.totalorder %s2931_s15, %s2924_s13 }
  0xd8   : > { %p2927_p7 = pnand %p2925_p10, %p3884_p3 }
  0xd9   : > { %p2934_p9 = por %p2933_p5, %p2932_p13 }
  0xda   : > { %p2928_p12 = pneg %p2927_p7 }
  0xdc   : > { %p2935_p11 = pnand %p2934_p9, %p2928_p12 }
  0xde   : > { %2938 = shalt.err (!%p2935_p11)
}
  0xdf   : > { %2640 = dma.hbm_to_vmem [thread:$0]  (!%p3885_p1), %s3820_s11, 16, %s525_s24, [#allocation15]  }
  0xe0   : > { %s2939_s14 = scalar_lea.hbm %s3821_s12, 16 }
  0xe1   : > { %p2940_p2 = scmp.ne.s32.totalorder %s3821_s12, %s2939_s14  ;;  %p2946_p4 = scmp.lt.u32.totalorder %s2939_s14, %s3821_s12 }
  0xe3   : > { %p2942_p6 = pnand %p2940_p2, %p3884_p3 }
  0xe5   : > { %p2943_p8 = pneg %p2942_p6 }
  0xe7   : > { %p2948_p0 = pnand %p2946_p4, %p2943_p8 }
  0xe9   : > { %2951 = shalt.err (!%p2948_p0)
}
  0xea   : > { %s2952_s13 = scalar_lea.vmem %s536_s28, 16  ;;  %s2959_s24 = scalar_lea.vmem %s536_s28, 32 }
  0xeb   : > { %p2953_p10 = scmp.ne.s32.totalorder %s536_s28, %s2952_s13  ;;  %p2960_p13 = scmp.lt.s32.totalorder %s536_s28, %s536_s28 }
  0xec   : > { %p2961_p5 = scmp.lt.s32.totalorder %s2959_s24, %s2952_s13 }
  0xed   : > { %p2955_p7 = pnand %p2953_p10, %p3884_p3 }
  0xee   : > { %p2962_p9 = por %p2961_p5, %p2960_p13 }
  0xef   : > { %p2956_p12 = pneg %p2955_p7 }
  0xf1   : > { %p2963_p11 = pnand %p2962_p9, %p2956_p12 }
  0xf3   : > { %2966 = shalt.err (!%p2963_p11)
}
  0xf4   : > { %2643 = dma.hbm_to_vmem [thread:$0]  (!%p3885_p1), %s3821_s12, 16, %s536_s28, [#allocation18]  }
  0xf5   : > { %s3886_s29 = sld [smem:[#allocation33_spill]]  ;;  %s562_s14 = scalar_lea.vmem [#allocation2], %s3379_s16 }
  0xf6   : > { %s569_s1 = sshll.u32 %s562_s14, 4  ;;  %s3513_s9 = scalar_lea.hbm %s3811_s2, %s3382_s19  ;;  %s3507_s1 = int_to_ptr.vmem [resolvable:$true] %s569_s1 }
  0xf7   : > { %s3887_s20 = sand.u32 1, %s3109_s26   ;;  %p3888_p1 = scmp.ne.s32.totalorder %s3883_s22, 0 }
  0xf8   : > { %s559_s28 = scalar_lea.sflag [#allocation3], %s3887_s20 }
  0xfb   : > { %s3504_s4 = scalar_lea.hbm %s3886_s29, %s3382_s19  ;;  %s2972_s10 = scalar_lea.hbm %s3886_s29, 256 }
  0xfc   : > { %s2967_s13 = scalar_lea.hbm %s3504_s4, 128  ;;  %p2973_p8 = scmp.lt.u32.totalorder %s3504_s4, %s3886_s29 }
  0xfd   : > { %p2968_p3 = scmp.ne.s32.totalorder %s3504_s4, %s2967_s13  ;;  %p2974_p4 = scmp.lt.u32.totalorder %s2972_s10, %s2967_s13 }
  0xfe   : > { %p2976_p10 = scmp.lt.u32.totalorder %s2967_s13, %s3504_s4 }
  0xff   : > { %p2970_p2 = pnand %p2968_p3, %p3888_p1  ;;  %p2975_p0 = por %p2974_p4, %p2973_p8 }
 0x101   : > { %p2971_p6 = pneg %p2970_p2  ;;  %p2977_p7 = por %p2976_p10, %p2975_p0 }
 0x103   : > { %p2978_p12 = pnand %p2977_p7, %p2971_p6 }
 0x105   : > { %2981 = shalt.err (!%p2978_p12)
}
 0x106   : > { %s2982_s19 = scalar_lea.vmem %s3507_s1, 128  ;;  %s3125_s14 = smov [#allocation2]  }
 0x107   : > { %p2983_p13 = scmp.ne.s32.totalorder %s3507_s1, %s2982_s19  ;;  %s2987_s27 = sshll.u32 %s3125_s14, 4  ;;  %s2988_s27 = int_to_ptr.vmem [resolvable:$false] %s2987_s27 }
 0x108   : > { %s2989_s5 = scalar_lea.vmem %s2988_s27, 256  ;;  %p2990_p11 = scmp.lt.s32.totalorder %s3507_s1, %s2988_s27 }
 0x109   : > { %p2985_p5 = pnand %p2983_p13, %p3888_p1  ;;  %p2991_p3 = scmp.lt.s32.totalorder %s2989_s5, %s2982_s19 }
 0x10b   : > { %p2986_p9 = pneg %p2985_p5  ;;  %p2992_p2 = por %p2991_p3, %p2990_p11 }
 0x10d   : > { %p2993_p8 = pnand %p2992_p2, %p2986_p9 }
 0x10f   : > { %2996 = shalt.err (!%p2993_p8)
}
 0x110   : > { %p3889_p6 = scmp.ne.s32.totalorder %s3881_s17, 0  ;;  %s598_s20 = scalar_lea.vmem [#allocation7], %s3379_s16 }
 0x111   : > { %s605_s13 = sshll.u32 %s598_s20, 4  ;;  %s2997_s24 = scalar_lea.hbm %s3513_s9, 128  ;;  %s606_s13 = int_to_ptr.vmem [resolvable:$true] %s605_s13 }
 0x112   : > { %2647 = dma.hbm_to_vmem [thread:$0]  (!%p3889_p6), %s3504_s4, 128, %s3507_s1, %s559_s28  }
 0x113   : > { %p2998_p4 = scmp.ne.s32.totalorder %s3513_s9, %s2997_s24  ;;  %s3002_s18 = scalar_lea.hbm %s3811_s2, 256 }
 0x114   : > { %p3003_p7 = scmp.lt.u32.totalorder %s3513_s9, %s3811_s2  ;;  %p3004_p12 = scmp.lt.u32.totalorder %s3002_s18, %s2997_s24 }
 0x115   : > { %p3000_p0 = pnand %p2998_p4, %p3888_p1  ;;  %p3006_p5 = scmp.lt.u32.totalorder %s2997_s24, %s3513_s9 }
 0x116   : > { %p3005_p13 = por %p3004_p12, %p3003_p7 }
 0x117   : > { %p3001_p10 = pneg %p3000_p0 }
 0x118   : > { %p3007_p9 = por %p3006_p5, %p3005_p13 }
 0x11a   : > { %p3008_p11 = pnand %p3007_p9, %p3001_p10 }
 0x11c   : > { %3011 = shalt.err (!%p3008_p11)
}
 0x11d   : > { %s3012_s16 = scalar_lea.vmem %s606_s13, 128  ;;  %s3126_s4 = smov [#allocation7]  }
 0x11e   : > { %p3013_p3 = scmp.ne.s32.totalorder %s606_s13, %s3012_s16  ;;  %s3017_s1 = sshll.u32 %s3126_s4, 4  ;;  %s3018_s1 = int_to_ptr.vmem [resolvable:$false] %s3017_s1 }
 0x11f   : > { %s3019_s28 = scalar_lea.vmem %s3018_s1, 256  ;;  %p3020_p4 = scmp.lt.s32.totalorder %s606_s13, %s3018_s1 }
 0x120   : > { %p3015_p2 = pnand %p3013_p3, %p3888_p1  ;;  %p3021_p0 = scmp.lt.s32.totalorder %s3019_s28, %s3012_s16 }
 0x122   : > { %p3016_p8 = pneg %p3015_p2  ;;  %p3022_p6 = por %p3021_p0, %p3020_p4 }
 0x124   : > { %p3023_p7 = pnand %p3022_p6, %p3016_p8 }
 0x126   : > { %3026 = shalt.err (!%p3023_p7)
}
 0x127   : > { %p3890_p12 = scmp.ne.s32.totalorder %s3881_s17, 0  ;;  %p3891_p10 = scmp.ne.s32.totalorder %s3868_s30, 0 }
 0x128   : > { %s3560_s22 = sand.u32 (!%p3891_p10), 1, %s3105_s25   ;;  %p3892_p1 = scmp.ne.s32.totalorder (!%p3891_p10), %s3876_s21, 0 }
 0x129   : > { %2653 = dma.hbm_to_vmem [thread:$0]  (!%p3890_p12), %s3513_s9, 128, %s606_s13, %s3398_s7  }
 0x12a   : > { %614 = sbr.rel (%p3891_p10) target bundleno = 3962 (0xf7a), region = 88  ;;  %s3563_s14 = sshll.u32 (!%p3891_p10), %s3560_s22, 3 }
 0x12b   : > { %s617_s27 = scalar_lea.sflag (!%p3891_p10), [#allocation3], %s3560_s22  ;;  %s620_s5 = scalar_lea.vmem (!%p3891_p10), [#allocation2], %s3563_s14 }
 0x131   : > { %3072 = dma.done.wait (%p3892_p1), %s617_s27, 128  }
 0x132   : > { %3074 = vsyncadd (%p3892_p1), %s617_s27, 4294967168  ;;  %s625_s7 = sand.u32 1, %s3245_s0   ;;  %s629_s17 = scalar_lea.vmem [#allocation5], %s3563_s14 }
 0x133   : > { %s626_s30 = scalar_lea.sflag [#allocation6], %s625_s7 }
 0x134   : > { %3076 = dma.done.wait (%p3892_p1), %s626_s30, 256  }
 0x135   : > { %3078 = vsyncadd (%p3892_p1), %s626_s30, 4294967040  ;;  %s638_s9 = scalar_lea.vmem [#allocation7], %s3563_s14  ;;  %p3893_p6 = scmp.eq.s32.totalorder %s3245_s0, 0 }
 0x137   : > { %3080 = dma.done.wait (%p3893_p6), [#allocation9], 272   ;;  %p3894_p13 = pmov %p3893_p6 }
 0x138   : > { %p3895_p5 = pmov %p3893_p6 }
 0x139   : > { %3082 = vsyncadd (%p3894_p13), [#allocation9], 4294967024 }
 0x13a   : > { %3084 = dma.done.wait (%p3895_p5), [#allocation12], 272   ;;  %p3896_p9 = pmov %p3895_p5 }
 0x13b   : > { %p3897_p11 = pmov %p3895_p5 }
 0x13c   : > { %3086 = vsyncadd (%p3896_p9), [#allocation12], 4294967024 }
 0x13d   : > { %3088 = dma.done.wait (%p3897_p11), [#allocation15], 32   ;;  %p3898_p3 = pmov %p3895_p5 }
 0x13f   : > { %3090 = vsyncadd (%p3898_p3), [#allocation15], 4294967264  ;;  %p3899_p2 = pmov %p3898_p3 }
 0x141   : > { %3092 = dma.done.wait (%p3899_p2), [#allocation18], 16   ;;  %p3900_p8 = pmov %p3899_p2 }
 0x142   : > { %v3127_v0 = vmov 0.0|0.0   ;;  %vm3128_vm0 = vmmov 0   ;;  %v3129_v1 = vmov 0.0   ;;  %v730_v2 = vld [vmem:[%s3812_s3] sm:$0xff]  ;;  %v731_v3 = vld [vmem:[%s3812_s3 + $0x8] sm:$0xff]  ;;  %v815_v4 = vld [vmem:[#allocation8] sm:$0xff] }
 0x143   : > { %3094 = vsyncadd (%p3900_p8), [#allocation18], 4294967280  ;;  %2565 = vmatprep.subr.bf16.mxu0 %v3127_v0  ;;  %2571 = vmatprep.subr.bf16.mxu1 %v3127_v0  ;;  %v2566_v5 = vpack.c.bf16 %v731_v3, %v730_v2  ;;  %v816_v6 = vld [vmem:[#allocation8 + $0x8] sm:$0xff]  ;;  %v732_v7 = vld [vmem:[%s3812_s3 + $0x10] sm:$0xff]  ;;  %vm824_vm1 = vcmask 130048   ;;  %vm741_vm2 = vcmask 261120  }
 0x144   : > { %2477 = vmatprep.mubr.msk.f32.mxu1 %vm3128_vm0, %v3129_v1  ;;  %2470 = vmatprep.mubr.msk.f32.mxu0 %vm3128_vm0, %v3129_v1  ;;  %v2572_v8 = vpack.c.bf16 %v816_v6, %v815_v4  ;;  %v733_v9 = vld [vmem:[%s3812_s3 + $0x18] sm:$0xff]  ;;  %v3619_v12 = vld [vmem:[%s620_s5] sm:$0xff]  ;;  %vm980_vm3 = vcmask 64512   ;;  %s3901_s4 = sld [smem:[#allocation35_spill]]  ;;  %s3130_s1 = smov 120  }
 0x145   : > { %2567 = vmatpush3.bf16.msra.mxu0 %v2566_v5  ;;  %v2569_v10 = vpack.c.bf16 %v733_v9, %v732_v7  ;;  %v728_v11 = vld [vmem:[%s629_s17] sm:$0xff]  ;;  %v898_v13 = vld [vmem:[#allocation11] sm:$0xff]  ;;  %v2385_v17 = vld [vmem:[#allocation10] ss:$0 sm:$0xff]  ;;  %s3131_s28 = smov 112   ;;  %s3132_s27 = smov 104  }
 0x146   : > { %2573 = vmatpush3.bf16.msra.mxu1 %v2572_v8  ;;  %2568 = vmatprep.subr.bf16.mxu0 %v3127_v0  ;;  %v899_v14 = vld [vmem:[#allocation11 + $0x8] sm:$0xff]  ;;  %v2387_v30 = vld [vmem:[#allocation13] ss:$0 sm:$0xff]  ;;  %s3902_s30 = sld [smem:[#allocation38_spill]]  ;;  %s3903_s18 = sld [smem:[#allocation40_spill]] }
 0x147   : > { %2574 = vmatprep.subr.bf16.mxu1 %v3127_v0  ;;  %v2575_v15 = vpack.c.bf16 %v899_v14, %v898_v13  ;;  %v729_v16 = vld [vmem:[%s638_s9] sm:$0xff]  ;;  %s3904_s7 = sld [smem:[#allocation42_spill]]  ;;  %s3905_s13 = sld [smem:[#allocation41_spill]] }
 0x148   : > { %s3906_s10 = sld [smem:[#allocation43_spill]]  ;;  %s3907_s23 = sld [smem:[#allocation31_spill]] }
 0x149   : > { %2478 = vmatmul.mubr.msk.f32.vlgmr.msra.gmra.mrb[0].mxu1 %vm824_vm1, %v728_v11  ;;  %2570 = vmatpush3.bf16.msra.mxu0 %v2569_v10  ;;  %s2416_s19 = sshll.u32 %s3245_s0, 7  ;;  %s726_s16 = scalar_lea.vmem [#allocation19], %s3563_s14 }
 0x14a   : > { %2487 = vmatprep.subr.mxu0 %v3129_v1  ;;  %2484 = vmatprep.mubr.msk.f32.mxu1 %vm3128_vm0, %v3129_v1  ;;  %v2383_v21 = vld [vmem:[%s3901_s4] ss:$0 sm:$0xff]  ;;  %s2175_s4 = sshll.u32 %s726_s16, 4  ;;  %s2162_s9 = scalar_lea.sflag [#allocation4], %s3560_s22  ;;  %s3766_s4 = int_to_ptr.vmem [resolvable:$true] %s2175_s4 }
 0x14b   : > { %2576 = vmatpush3.bf16.msra.mxu1 %v2575_v15  ;;  %s3027_s21 = scalar_lea.vmem %s3766_s4, 128  ;;  %s3133_s0 = smov [#allocation19]  }
 0x14c   : > { %2471 = vmatmul.mubr.msk.f32.vlgmr.msra.gmra.mrb[0].mxu0 %vm741_vm2, %v3619_v12  ;;  %2492 = vmatprep.subr.mxu1 %v3129_v1  ;;  %v2395_v50 = vld [vmem:[%s3902_s30 + $0x8] sm:$0xff]  ;;  %v1141_v55 = vld [vmem:[%s3902_s30] sm:$0xff]  ;;  %p3028_p4 = scmp.ne.s32.totalorder %s3766_s4, %s3027_s21  ;;  %s3031_s14 = sshll.u32 %s3133_s0, 4  ;;  %s3032_s14 = int_to_ptr.vmem [resolvable:$false] %s3031_s14 }
 0x14d   : > { %2489 = vmatprep.mubr.msk.f32.mxu0 %vm3128_vm0, %v3129_v1  ;;  %s3033_s20 = scalar_lea.vmem %s3032_s14, 256  ;;  %p3034_p10 = scmp.lt.s32.totalorder %s3766_s4, %s3032_s14 }
 0x14e   : > { %2485 = vmatmul.mubr.msk.f32.vlgmr.msra.gmra.mrb[2].mxu1 %vm824_vm1, %v729_v16  ;;  %p3910_p0 = scmp.ne.s32.totalorder %s3907_s23, 0  ;;  %p3035_p1 = scmp.lt.s32.totalorder %s3033_s20, %s3027_s21 }
 0x14f   : > { %2494 = vmatprep.mubr.msk.f32.mxu1 %vm3128_vm0, %v3129_v1 }
 0x150   : > { %p3029_p7 = pnand %p3028_p4, %p3910_p0  ;;  %p3036_p6 = por %p3035_p1, %p3034_p10 }
 0x152   : > { %p3030_p12 = pneg %p3029_p7 }
 0x154   : > { %p3037_p13 = pnand %p3036_p6, %p3030_p12 }
 0x21c   : > { %v894_v18 = vpop.f32.mrb[0].mxu1 }
 0x21d   : > { %v895_v19 = vadd.f32 %v2385_v17, %v894_v18  ;;  %v2479_v20 = vpop.f32.mrb[1].mxu1 }
 0x21e   : > { %v2401_v20 = vld [vmem:[%s3902_s30 + $0x10] sm:$0xff] }
 0x21f   : > { %1144 = vrot.lane.b32.xlu0 %v895_v19, %s3130_s1  ;;  %2488 = vmatpush3.xpose.msk.msra.mxu0 %vm980_vm3, %v895_v19  ;;  %v811_v22 = vpop.f32.mrb[0].mxu0 }
 0x220   : > { %v3639_v23 = vadd.f32 %v2383_v21, %v811_v22  ;;  %v2472_v24 = vpop.f32.mrb[1].mxu0  ;;  %2497 = vmatprep.subr.mxu0 %v3129_v1 }
 0x221   : > { %v976_v31 = vpop.f32.mrb[2].mxu1 }
 0x222   : > { %2490 = vmatmul.mubr.msk.f32.vlgmr.msra.gmra.mrb[2].mxu0 %vm980_vm3, %v3639_v23  ;;  %v3654_v32 = vadd.f32 %v2387_v30, %v976_v31  ;;  %v2486_v33 = vpop.f32.mrb[3].mxu1  ;;  %v2406_v31 = vld [vmem:[%s3902_s30 + $0x18] sm:$0xff] }
 0x223   : > { %1142 = vrot.lane.b32.xlu0 %v3639_v23, %s3130_s1  ;;  %2499 = vmatprep.mubr.msk.f32.mxu0 %vm3128_vm0, %v3129_v1 }
 0x224   : > { %2493 = vmatpush3.msra.mxu1 %v3654_v32 }
 0x225   : > { %2502 = vmatprep.subr.mxu1 %v3129_v1 }
 0x291   : > { %v1145_v25 = vpop.permute.xlu0 %1144 }
 0x292   : > { %2498 = vmatpush3.xpose.msk.msra.mxu0 %vm980_vm3, %v1145_v25 }
 0x293   : > { %2507 = vmatprep.subr.mxu0 %v3129_v1 }
 0x295   : > { %v1143_v26 = vpop.permute.xlu0 %1142 }
 0x296   : > { %2500 = vmatmul.mubr.msk.f32.vlgmr.msra.gmra.mrb[4].mxu0 %vm980_vm3, %v1143_v26 }
 0x297   : > { %2509 = vmatprep.mubr.msk.f32.mxu0 %vm3128_vm0, %v3129_v1  ;;  %2508 = vmatpush3.msra.mxu0 %v2395_v50 }
 0x298   : > { %2517 = vmatprep.subr.mxu0 %v3129_v1 }
 0x2f5   : > { %v1053_v27 = vpop.f32.mrb[2].mxu0 }
 0x2f6   : > { %v2491_v28 = vpop.f32.mrb[3].mxu0  ;;  %v1057_v29 = vsel %vm980_vm3, %v1053_v27, -inf }
 0x2f7   : > { %1058 = vmax.xlane.f32.xlu1 %v1057_v29 }
 0x369   : > { %v1216_v34 = vpop.f32.mrb[4].mxu0 }
 0x36a   : > { %v2501_v35 = vpop.f32.mrb[5].mxu0  ;;  %v1220_v36 = vsel %vm980_vm3, %v1216_v34, -inf }
 0x36b   : > { %1221 = vmax.xlane.f32.xlu1 %v1220_v36 }
 0x384   : > { %v1059_v37 = vpop.xlane.xlu1 %1058 }
 0x385   : > { %v1060_v38 = vsub.f32 %v1053_v27, %v1059_v37 }
 0x387   : > { %v1061_v39 = vmul.f32 1.442695, %v1060_v38 }
 0x389   : > { %2721 = vpow2.f32 %v1061_v39 }
 0x393   : > { %v2722_v40 = vpop.eup %2721 }
 0x394   : > { %v1063_v41 = vsel %vm980_vm3, %v2722_v40, 0.0 }
 0x395   : > { %1064 = vadd.xlane.f32.xlu0 %v1063_v41 }
 0x3ab   : > { %1545 = vrot.lane.b32.xlu0 %v3654_v32, %s3131_s28 }
 0x3af   : > { %1699 = vrot.lane.b32.xlu0 %v895_v19, %s3132_s27 }
 0x3f8   : > { %v1222_v42 = vpop.xlane.xlu1 %1221 }
 0x3f9   : > { %v1223_v43 = vsub.f32 %v1216_v34, %v1222_v42  ;;  %v2408_v42 = vld [vmem:[#allocation14] ss:$0 sm:$0xff] }
 0x3fb   : > { %v1224_v44 = vmul.f32 1.442695, %v1223_v43 }
 0x3fd   : > { %2723 = vpow2.f32 %v1224_v44 }
 0x407   : > { %v2724_v45 = vpop.eup %2723 }
 0x408   : > { %v1226_v46 = vsel %vm980_vm3, %v2724_v45, 0.0 }
 0x409   : > { %1227 = vadd.xlane.f32.xlu1 %v1226_v46 }
 0x41a   : > { %1232 = vrot.lane.b32.xlu1 %v3654_v32, %s3130_s1 }
 0x41e   : > { %1458 = vrot.lane.b32.xlu1 %v895_v19, %s3131_s28 }
 0x422   : > { %1456 = vrot.lane.b32.xlu1 %v3639_v23, %s3131_s28  ;;  %v1065_v47 = vpop.xlane.xlu0 %1064 }
 0x423   : > { %2725 = vrcp.f32 %v1065_v47 }
 0x426   : > { %v1546_v57 = vpop.permute.xlu0 %1545 }
 0x42a   : > { %v1700_v15 = vpop.permute.xlu0 %1699 }
 0x42d   : > { %v2726_v48 = vpop.eup %2725 }
 0x42e   : > { %v1067_v49 = vmul.f32 %v2726_v48, %v2722_v40 }
 0x430   : > { %2495 = vmatmul.mubr.msk.f32.vlgmr.msra.gmra.mrb[4].mxu1 %vm980_vm3, %v1067_v49 }
 0x431   : > { %2504 = vmatprep.mubr.msk.f32.mxu1 %vm3128_vm0, %v3129_v1 }
 0x496   : > { %v1228_v51 = vpop.xlane.xlu1 %1227 }
 0x497   : > { %2727 = vrcp.f32 %v1228_v51 }
 0x49a   : > { %v1233_v52 = vpop.permute.xlu1 %1232 }
 0x49b   : > { %2503 = vmatpush3.msra.mxu1 %v1233_v52 }
 0x49c   : > { %2512 = vmatprep.subr.mxu1 %v3129_v1 }
 0x49e   : > { %v1459_v59 = vpop.permute.xlu1 %1458 }
 0x4a1   : > { %v2728_v53 = vpop.eup %2727 }
 0x4a2   : > { %v1230_v54 = vmul.f32 %v2728_v53, %v2724_v45  ;;  %v1457_v62 = vpop.permute.xlu1 %1456  ;;  %v1978_v53 = vld [vmem:[%s3903_s18 + $0x8] sm:$0xff] }
 0x4a4   : > { %2505 = vmatmul.mubr.msk.f32.vlgmr.msra.gmra.mrb[6].mxu1 %vm980_vm3, %v1230_v54 }
 0x4a5   : > { %2513 = vmatpush3.msra.mxu1 %v1141_v55  ;;  %2514 = vmatprep.mubr.msk.f32.mxu1 %vm3128_vm0, %v3129_v1  ;;  %v1980_v55 = vld [vmem:[%s3903_s18 + $0x18] sm:$0xff] }
 0x4a6   : > { %2522 = vmatprep.subr.mxu1 %v3129_v1 }
 0x503   : > { %v1137_v56 = vpop.f32.mrb[4].mxu1 }
 0x504   : > { %v2496_v58 = vpop.f32.mrb[5].mxu1  ;;  %2515 = vmatmul.mubr.msk.f32.vlgmr.msra.gmra.mrb[8].mxu1 %vm980_vm3, %v1137_v56 }
 0x505   : > { %2523 = vmatpush3.msra.mxu1 %v1546_v57  ;;  %2524 = vmatprep.mubr.msk.f32.mxu1 %vm3128_vm0, %v3129_v1 }
 0x506   : > { %2532 = vmatprep.subr.mxu1 %v3129_v1 }
 0x577   : > { %v1304_v60 = vpop.f32.mrb[6].mxu1 }
 0x578   : > { %v2506_v61 = vpop.f32.mrb[7].mxu1  ;;  %2510 = vmatmul.mubr.msk.f32.vlgmr.msra.gmra.mrb[6].mxu0 %vm980_vm3, %v1304_v60 }
 0x579   : > { %2518 = vmatpush3.xpose.msk.msra.mxu0 %vm980_vm3, %v1459_v59  ;;  %2519 = vmatprep.mubr.msk.f32.mxu0 %vm3128_vm0, %v3129_v1  ;;  %v2409_v61 = vld [vmem:[#allocation16] ss:$0 sm:$0xff] }
 0x57a   : > { %2527 = vmatprep.subr.mxu0 %v3129_v1 }
 0x57c   : > { %2520 = vmatmul.mubr.msk.f32.vlgmr.msra.gmra.mrb[8].mxu0 %vm980_vm3, %v1457_v62 }
 0x57d   : > { %2529 = vmatprep.mubr.msk.f32.mxu0 %vm3128_vm0, %v3129_v1  ;;  %2528 = vmatpush3.msra.mxu0 %v2401_v20 }
 0x57e   : > { %2537 = vmatprep.subr.mxu0 %v3129_v1 }
 0x5d7   : > { %v1452_v63 = vpop.f32.mrb[8].mxu1 }
 0x5d8   : > { %v2516_v2 = vpop.f32.mrb[9].mxu1 }
 0x64b   : > { %v1379_v3 = vpop.f32.mrb[6].mxu0 }
 0x64c   : > { %v1453_v4 = vadd.f32 %v1452_v63, %v1379_v3  ;;  %v2511_v5 = vpop.f32.mrb[7].mxu0  ;;  %v2410_v63 = vld [vmem:[#allocation17] ss:$0 sm:$0xff] }
 0x64f   : > { %v1530_v6 = vpop.f32.mrb[8].mxu0 }
 0x650   : > { %v2521_v7 = vpop.f32.mrb[9].mxu0  ;;  %v1534_v8 = vsel %vm980_vm3, %v1530_v6, -inf }
 0x651   : > { %1535 = vmax.xlane.f32.xlu1 %v1534_v8 }
 0x6de   : > { %v1536_v9 = vpop.xlane.xlu1 %1535 }
 0x6df   : > { %v1537_v10 = vsub.f32 %v1530_v6, %v1536_v9  ;;  %v2411_v6 = vld [vmem:[%s3905_s13] ss:$0 sm:$0xff] }
 0x6e1   : > { %v1538_v11 = vmul.f32 1.442695, %v1537_v10 }
 0x6e3   : > { %2729 = vpow2.f32 %v1538_v11  ;;  %v2413_v11 = vld [vmem:[%s3906_s10] ss:$0 sm:$0xff] }
 0x6ed   : > { %v2730_v13 = vpop.eup %2729 }
 0x6ee   : > { %v1540_v14 = vsel %vm980_vm3, %v2730_v13, 0.0 }
 0x6ef   : > { %1541 = vadd.xlane.f32.xlu0 %v1540_v14 }
 0x705   : > { %1697 = vrot.lane.b32.xlu0 %v3639_v23, %s3132_s27 }
 0x77c   : > { %v1542_v16 = vpop.xlane.xlu0 %1541 }
 0x77d   : > { %2731 = vrcp.f32 %v1542_v16 }
 0x780   : > { %v1698_v19 = vpop.permute.xlu0 %1697 }
 0x787   : > { %v2732_v17 = vpop.eup %2731 }
 0x788   : > { %v1544_v18 = vmul.f32 %v2732_v17, %v2730_v13 }
 0x78a   : > { %2525 = vmatmul.mubr.msk.f32.vlgmr.msra.gmra.mrb[10].mxu1 %vm980_vm3, %v1544_v18 }
 0x78b   : > { %2533 = vmatpush3.xpose.msk.msra.mxu1 %vm980_vm3, %v1700_v15  ;;  %2534 = vmatprep.mubr.msk.f32.mxu1 %vm3128_vm0, %v3129_v1 }
 0x78c   : > { %2542 = vmatprep.subr.mxu1 %v3129_v1 }
 0x78e   : > { %2535 = vmatmul.mubr.msk.f32.vlgmr.msra.gmra.mrb[12].mxu1 %vm980_vm3, %v1698_v19 }
 0x78f   : > { %2544 = vmatprep.mubr.msk.f32.mxu1 %vm3128_vm0, %v3129_v1  ;;  %2543 = vmatpush3.msra.mxu1 %v2406_v31 }
 0x790   : > { %2583 = vmatprep.subr.bf16.mxu1 %v3127_v0 }
 0x85d   : > { %v1617_v21 = vpop.f32.mrb[10].mxu1 }
 0x85e   : > { %v2526_v22 = vpop.f32.mrb[11].mxu1  ;;  %2530 = vmatmul.mubr.msk.f32.vlgmr.msra.gmra.mrb[10].mxu0 %vm980_vm3, %v1617_v21 }
 0x85f   : > { %2539 = vmatprep.mubr.msk.f32.mxu0 %vm3128_vm0, %v3129_v1 }
 0x861   : > { %v1771_v23 = vpop.f32.mrb[12].mxu1 }
 0x862   : > { %v2536_v24 = vpop.f32.mrb[13].mxu1  ;;  %v1775_v25 = vsel %vm980_vm3, %v1771_v23, -inf }
 0x863   : > { %1776 = vmax.xlane.f32.xlu0 %v1775_v25 }
 0x8f0   : > { %v1777_v26 = vpop.xlane.xlu0 %1776 }
 0x8f1   : > { %v1778_v27 = vsub.f32 %v1771_v23, %v1777_v26 }
 0x8f3   : > { %v1779_v28 = vmul.f32 1.442695, %v1778_v27 }
 0x8f5   : > { %2733 = vpow2.f32 %v1779_v28 }
 0x8ff   : > { %v2734_v29 = vpop.eup %2733 }
 0x900   : > { %v1781_v30 = vsel %vm980_vm3, %v2734_v29, 0.0 }
 0x901   : > { %1782 = vadd.xlane.f32.xlu1 %v1781_v30 }
 0x912   : > { %1786 = vrot.lane.b32.xlu1 %v3654_v32, %s3132_s27  ;;  %s3908_s27 = sld [smem:[#allocation44_spill]] }
 0x918   : > { %s3909_s5 = smov %s3908_s27  ;;  %s3764_s17 = scalar_lea.hbm %s3908_s27, %s2416_s19 }
 0x931   : > { %v1692_v33 = vpop.f32.mrb[10].mxu0 }
 0x932   : > { %v1696_v34 = vadd.f32 %v1692_v33, %v1453_v4  ;;  %v2531_v35 = vpop.f32.mrb[11].mxu0  ;;  %v2062_v4 = vld [vmem:[%s3904_s7] sm:$0xff] }
 0x98e   : > { %v1783_v36 = vpop.xlane.xlu1 %1782 }
 0x98f   : > { %2735 = vrcp.f32 %v1783_v36 }
 0x992   : > { %v1787_v37 = vpop.permute.xlu1 %1786 }
 0x993   : > { %2538 = vmatpush3.msra.mxu0 %v1787_v37 }
 0x994   : > { %2577 = vmatprep.subr.bf16.mxu0 %v3127_v0 }
 0x999   : > { %v2736_v38 = vpop.eup %2735 }
 0x99a   : > { %v1785_v39 = vmul.f32 %v2736_v38, %v2734_v29 }
 0x99c   : > { %2540 = vmatmul.mubr.msk.f32.vlgmr.msra.gmra.mrb[12].mxu0 %vm980_vm3, %v1785_v39 }
 0x99d   : > { %2555 = vmatprep.mubr.msk.f32.mxu0 %vm3128_vm0, %v3129_v1 }
 0xa6f   : > { %v1858_v32 = vpop.f32.mrb[12].mxu0 }
 0xa70   : > { %v2541_v40 = vpop.f32.mrb[13].mxu0  ;;  %2545 = vmatmul.mubr.msk.f32.vlgmr.msra.gmra.mrb[14].mxu1 %vm980_vm3, %v1858_v32 }
 0xa71   : > { %2562 = vmatprep.mubr.msk.f32.mxu1 %vm3128_vm0, %v3129_v1  ;;  %v1977_v1 = vld [vmem:[%s3903_s18] sm:$0xff] }
 0xa72   : > { %v2578_v54 = vpack.c.bf16 %v1978_v53, %v1977_v1 }
 0xa74   : > { %2579 = vmatpush3.bf16.msra.mxu0 %v2578_v54 }
 0xa75   : > { %2580 = vmatprep.subr.bf16.mxu0 %v3127_v0  ;;  %v2063_v0 = vld [vmem:[%s3904_s7 + $0x8] sm:$0xff] }
 0xa76   : > { %v2584_v5 = vpack.c.bf16 %v2063_v0, %v2062_v4 }
 0xa78   : > { %2585 = vmatpush3.bf16.msra.mxu1 %v2584_v5 }
 0xb43   : > { %v1933_v41 = vpop.f32.mrb[14].mxu1 }
 0xb44   : > { %v1937_v43 = vadd.f32 %v1933_v41, %v1696_v34  ;;  %v2546_v44 = vpop.f32.mrb[15].mxu1 }
 0xb46   : > { %v1945_v45 = vadd.f32 %v2408_v42, %v1937_v43 }
 0xb48   : > { %v1948_v46 = vadd.f32 %v1945_v45, %v3619_v12  ;;  %v1979_v12 = vld [vmem:[%s3903_s18 + $0x10] sm:$0xff] }
 0xb49   : > { %v2581_v56 = vpack.c.bf16 %v1980_v55, %v1979_v12 }
 0xb4a   : > { %v1949_v47 = vsel %vm741_vm2, %v1948_v46, 0.0 }
 0xb4b   : > { %1950 = vadd.xlane.f32.xlu1 %v1949_v47  ;;  %2582 = vmatpush3.bf16.msra.mxu0 %v2581_v56 }
 0xbd8   : > { %v1951_v48 = vpop.xlane.xlu1 %1950 }
 0xbd9   : > { %v1953_v49 = vmul.f32 0.03125, %v1951_v48 }
 0xbdb   : > { %v1954_v50 = vsub.f32 %v1948_v46, %v1953_v49 }
 0xbdd   : > { %v1955_v51 = vmul.f32 %v1954_v50, %v1954_v50 }
 0xbdf   : > { %v1956_v52 = vsel %vm741_vm2, %v1955_v51, 0.0 }
 0xbe0   : > { %1957 = vadd.xlane.f32.xlu0 %v1956_v52 }
 0xc6d   : > { %v1958_v57 = vpop.xlane.xlu0 %1957 }
 0xc6e   : > { %v1959_v58 = vmul.f32 0.03125, %v1958_v57 }
 0xc70   : > { %v1960_v59 = vadd.f32 1e-12, %v1959_v58 }
 0xc72   : > { %2737 = vrsqrt.f32 %v1960_v59 }
 0xc7c   : > { %v2738_v60 = vpop.eup %2737 }
 0xc7d   : > { %v1962_v62 = vmul.f32 %v2738_v60, %v1954_v50 }
 0xc7f   : > { %v1969_v2 = vmul.f32 %v2409_v61, %v1962_v62 }
 0xc81   : > { %v1976_v3 = vadd.f32 %v2410_v63, %v1969_v2 }
 0xc83   : > { %2556 = vmatmul.mubr.msk.f32.vlgmr.msra.gmra.mrb[14].mxu0 %vm741_vm2, %v1976_v3 }
 0xd56   : > { %v2057_v7 = vpop.f32.mrb[14].mxu0 }
 0xd57   : > { %v2058_v8 = vadd.f32 %v2411_v6, %v2057_v7  ;;  %v2557_v9 = vpop.f32.mrb[15].mxu0 }
 0xd59   : > { %v2061_v10 = vmax.f32 %v2058_v8, 0.0 }
 0xd5b   : > { %2563 = vmatmul.mubr.msk.f32.vlgmr.msra.gmra.mrb[16].mxu1 %vm824_vm1, %v2061_v10 }
 0xe2e   : > { %v2140_v13 = vpop.f32.mrb[16].mxu1 }
 0xe2f   : > { %v2141_v14 = vadd.f32 %v2413_v11, %v2140_v13  ;;  %v2564_v15 = vpop.f32.mrb[17].mxu1 }
 0xe31   : > { %v2144_v16 = vadd.f32 %v2141_v14, %v1976_v3 }
 0xe33   : > { %v2145_v17 = vsel %vm741_vm2, %v2144_v16, 0.0 }
 0xe34   : > { %2146 = vadd.xlane.f32.xlu0 %v2145_v17 }
 0xec1   : > { %v2147_v18 = vpop.xlane.xlu0 %2146 }
 0xec2   : > { %v2148_v19 = vmul.f32 0.03125, %v2147_v18 }
 0xec4   : > { %v2149_v20 = vsub.f32 %v2144_v16, %v2148_v19 }
 0xec6   : > { %v2150_v21 = vmul.f32 %v2149_v20, %v2149_v20 }
 0xec8   : > { %v2151_v22 = vsel %vm741_vm2, %v2150_v21, 0.0 }
 0xec9   : > { %2152 = vadd.xlane.f32.xlu0 %v2151_v22 }
 0xf56   : > { %v2153_v23 = vpop.xlane.xlu0 %2152 }
 0xf57   : > { %v2154_v24 = vmul.f32 0.03125, %v2153_v23 }
 0xf59   : > { %v2155_v25 = vadd.f32 1e-12, %v2154_v24 }
 0xf5b   : > { %2739 = vrsqrt.f32 %v2155_v25 }
 0xf65   : > { %v2740_v26 = vpop.eup %2739 }
 0xf66   : > { %v2157_v27 = vmul.f32 %v2740_v26, %v2149_v20 }
 0xf68   : > { %v2158_v28 = vmul.f32 %v2409_v61, %v2157_v27 }
 0xf6a   : > { %v2159_v29 = vadd.f32 %v2410_v63, %v2158_v28 }
 0xf6c   : > { %2160 = vst.msk [vmem:[%s726_s16] sm:$0xff] %vm741_vm2, %v2159_v29 }
 0xf6d   : > { %3040 = shalt.err (!%p3037_p13)
}
 0xf6e   : > { %s3041_s22 = scalar_lea.hbm %s3764_s17, 128  ;;  %s3045_s15 = scalar_lea.hbm %s3909_s5, 256 }
 0xf6f   : > { %p3042_p5 = scmp.ne.s32.totalorder %s3764_s17, %s3041_s22  ;;  %p3046_p3 = scmp.lt.u32.totalorder %s3764_s17, %s3909_s5 }
 0xf70   : > { %p3047_p2 = scmp.lt.u32.totalorder %s3045_s15, %s3041_s22  ;;  %p3049_p4 = scmp.lt.u32.totalorder %s3041_s22, %s3764_s17 }
 0xf71   : > { %p3043_p9 = pnand %p3042_p5, %p3910_p0 }
 0xf72   : > { %p3048_p8 = por %p3047_p2, %p3046_p3 }
 0xf73   : > { %p3044_p11 = pneg %p3043_p9 }
 0xf74   : > { %p3050_p7 = por %p3049_p4, %p3048_p8 }
 0xf76   : > { %p3051_p12 = pnand %p3050_p7, %p3044_p11 }
 0xf78   : > { %3054 = shalt.err (!%p3051_p12)
}
 0xf79   : > { %2620 = dma.vmem_to_hbm [thread:$0]  (%p3910_p0), %s3766_s4, 128, %s3764_s17, %s2162_s9  }
 0xf7a PF: > { %s3911_s16 = sld [smem:[#allocation27_spill]]  ;;  %s3912_s1 = sld [smem:[#allocation32_spill]] }
 0xf7b   : > { %s3913_s28 = sld [smem:[#allocation28_spill]] }
 0xf80   : > { %s2187_s27 = sand.u32 1, %s3911_s16   ;;  %p3914_p10 = scmp.ne.s32.totalorder %s3912_s1, 0 }
 0xf81   : > { %p3915_p1 = scmp.ge.s32.totalorder %s3913_s28, 2  ;;  %s2188_s21 = scalar_lea.sflag [#allocation4], %s2187_s27 }
 0xf83   : > { %p2655_p6 = pnand %p3915_p1, %p3914_p10 }
 0xf85   : > { %3096 = dma.done.wait (!%p2655_p6), %s2188_s21, 128  }
 0xf86   : > { %3098 = vsyncadd (!%p2655_p6), %s2188_s21, 4294967168  ;;  %s3916_s27 = sld [smem:[#allocation29_spill]]  ;;  %s3917_s0 = sld [smem:[#allocation30_spill]] }
 0xf87   : > { %s3918_s24 = smov %s3105_s25  ;;  %s3919_s25 = smov %s3109_s26 }
 0xf8c   : > { %p37_p13 = scmp.ge.s32.totalorder %s3916_s27, 4   ;;  %s3920_s26 = smov %s3917_s0 }
 0xf8e   :  { %39 = sbr.rel (!%p37_p13) target bundleno = 24 (0x18), region = 188 }
 0xf95   :  { %2193 = vsyncpa [#allocation3], 1 }
 0xf96   :  { %2195 = vsyncpa [#allocation3 + $0x1], 1 }
 0xf97   :  { %2196 = vsyncpa [#allocation6], 1 }
 0xf98   :  { %2198 = vsyncpa [#allocation6 + $0x1], 1 }
 0xf99   :  { %2199 = vsyncpa [#allocation9], 1 }
 0xf9a   :  { %2200 = vsyncpa [#allocation12], 1 }
 0xf9b   :  { %2201 = vsyncpa [#allocation15], 1 }
 0xf9c   :  { %2202 = vsyncpa [#allocation18], 1 }
 0xf9d   :  { %2203 = vsyncpa [#allocation4], 1 }
 0xf9e   :  { %2205 = vsyncpa [#allocation4 + $0x1], 1 }

</bundles_post_ra>
